<compile_context>
chip_gen: v7x
topology: tpu7x:2x2x1
jax: 0.10.0
libtpu: 0.0.40
codegen_flags: <defaults>
</compile_context>

<pallas_src>
import functools

import jax
import jax.numpy as jnp
from jax.experimental import pallas as pl
from jax.experimental.pallas import tpu as pltpu  # noqa: F401  (TPU backend)


def _decoder_kernel(
    x0_ref, rrec_ref, rsend_ref, rrect_ref, relg_ref,
    w1s_ref, w1r_ref, b1_ref, w2_ref, b2_ref, fold_ref,
    wo1x_ref, wo1a_ref, bo1_ref, wo2_ref, bo2_ref, wo3_ref, bo3_ref,
    o_ref, *, pred_steps):
  """Fused NRI decoder: all rows + all pred_steps in one invocation.

  x0_ref:   (R*N, D)        flattened initial node states (R = B*Tp rows)
  rrec/rsend: (R*E, R*N)    kron(I_R, rel_rec / rel_send) selection matrices
  rrect:    (R*N, R*E)      transpose of rrec (aggregation)
  relg:     (R*E, ET*H)     softmax(rel_graph) expanded per (edge, type-block)
  w1s/w1r:  (D, ET*H)       msg_fc1 packed, split for senders / receivers
  b1/b2:    (1, ET*H)
  w2:       (ET*H, ET*H)    msg_fc2 packed block-diagonally
  fold:     (ET*H, H)       stacked identities -> sums over edge types
  wo1x/wo1a:(D, H)/(H, H)   out_fc1 split for [x | agg] concat
  o_ref:    (pred_steps, R*N, D)
  """
  f32 = jnp.float32
  state = x0_ref[...]
  rrec = rrec_ref[...]
  rsend = rsend_ref[...]
  rrect = rrect_ref[...]
  relg = relg_ref[...]
  w1s = w1s_ref[...]
  w1r = w1r_ref[...]
  b1 = b1_ref[...]
  w2 = w2_ref[...]
  b2 = b2_ref[...]
  fold = fold_ref[...]
  wo1x = wo1x_ref[...]
  wo1a = wo1a_ref[...]
  bo1 = bo1_ref[...]
  wo2 = wo2_ref[...]
  bo2 = bo2_ref[...]
  wo3 = wo3_ref[...]
  bo3 = bo3_ref[...]

  # pred_steps is a small static int -> static unroll keeps the state in vregs.
  for step in range(pred_steps):
    recv = jnp.dot(rrec, state, preferred_element_type=f32)    # (R*E, D)
    send = jnp.dot(rsend, state, preferred_element_type=f32)   # (R*E, D)

    # pre_msg = cat([send, recv], -1); split matmul avoids the concat.
    m = (jnp.dot(send, w1s, preferred_element_type=f32)
         + jnp.dot(recv, w1r, preferred_element_type=f32) + b1)  # (R*E, ET*H)
    m = jnp.maximum(m, 0.0)
    m = jnp.dot(m, w2, preferred_element_type=f32) + b2          # block-diag fc2
    m = jnp.maximum(m, 0.0)
    m = m * relg                                                 # per-type weight
    all_msgs = jnp.dot(m, fold, preferred_element_type=f32)      # sum over types -> (R*E, H)

    agg = jnp.dot(rrect, all_msgs, preferred_element_type=f32)   # (R*N, H)

    # aug_inputs = cat([x, agg], -1); split matmul avoids the concat.
    h = (jnp.dot(state, wo1x, preferred_element_type=f32)
         + jnp.dot(agg, wo1a, preferred_element_type=f32) + bo1)
    h = jnp.maximum(h, 0.0)
    h = jnp.maximum(jnp.dot(h, wo2, preferred_element_type=f32) + bo2, 0.0)
    pred = jnp.dot(h, wo3, preferred_element_type=f32) + bo3

    state = state + pred
    o_ref[step] = state


def mlp_decoder_causal_forward(params, inputs, rel_rec, rel_send, tau, hard,
                               pred_steps, *, edge_types, skip_first):
  """Reproduces MLPDecoder_Causal.forward.

  inputs: [batch, num_atoms, time_steps, dims]  (PyTorch convention)
  returns: (pred_all [B, num_atoms, T-1, dims],
            rel_graph broadcast [B, num_edges, edge_types])
  """
  del tau, hard  # gumbel-sampled `edges` is unused by single_step_forward

  x = jnp.transpose(inputs, (0, 2, 1, 3)).astype(jnp.float32)   # [B, T, N, D]
  B, T, N, D = x.shape
  assert pred_steps <= T
  E = rel_rec.shape[0]
  ET = edge_types
  H = params["w2"].shape[-1]

  last = x[:, 0::pred_steps]                                    # [B, Tp, N, D]
  Tp = last.shape[1]
  R = B * Tp
  x0 = last.reshape(R * N, D)

  # --- grid-invariant precompute (hoisted out of the kernel) -----------------
  eye_r = jnp.eye(R, dtype=jnp.float32)
  rrec_big = jnp.kron(eye_r, rel_rec.astype(jnp.float32))       # (R*E, R*N)
  rsend_big = jnp.kron(eye_r, rel_send.astype(jnp.float32))     # (R*E, R*N)
  rrect_big = jnp.transpose(rrec_big)                           # (R*N, R*E)

  relg = jax.nn.softmax(params["rel_graph"][0, 0], axis=-1)     # (E, ET)
  if skip_first:
    relg = relg.at[:, 0].set(0.0)                               # skip edge type 0
  relg_exp = jnp.tile(jnp.repeat(relg, H, axis=1), (R, 1))      # (R*E, ET*H)

  w1 = params["w1"]                                             # (ET, 2D, H)
  w1s = jnp.transpose(w1[:, :D, :], (1, 0, 2)).reshape(D, ET * H)   # senders
  w1r = jnp.transpose(w1[:, D:, :], (1, 0, 2)).reshape(D, ET * H)   # receivers
  b1 = params["b1"].reshape(1, ET * H)
  w2bd = jnp.zeros((ET * H, ET * H), jnp.float32)
  for i in range(ET):
    w2bd = w2bd.at[i * H:(i + 1) * H, i * H:(i + 1) * H].set(params["w2"][i])
  b2 = params["b2"].reshape(1, ET * H)
  fold = jnp.tile(jnp.eye(H, dtype=jnp.float32), (ET, 1))       # (ET*H, H)

  wo1 = params["wo1"]                                           # (D+H, H)
  wo1x = wo1[:D, :]
  wo1a = wo1[D:, :]
  # ---------------------------------------------------------------------------

  kernel = functools.partial(_decoder_kernel, pred_steps=pred_steps)
  preds_flat = pl.pallas_call(
      kernel,
      out_shape=jax.ShapeDtypeStruct((pred_steps, R * N, D), jnp.float32),
  )(x0, rrec_big, rsend_big, rrect_big, relg_exp,
    w1s, w1r, b1, w2bd, b2, fold,
    wo1x, wo1a, params["bo1"], params["wo2"], params["bo2"],
    params["wo3"], params["bo3"])

  preds = preds_flat.reshape(pred_steps, B, Tp, N, D)
  # output[:, i::pred_steps] = preds[i]  <=> interleave steps along time.
  output = jnp.transpose(preds, (1, 2, 0, 3, 4)).reshape(B, Tp * pred_steps, N, D)
  pred_all = output[:, :T - 1]                                  # [B, T-1, N, D]

  rel_graph = params["rel_graph"]                               # (1, 1, E, ET)
  rel_out = jnp.broadcast_to(rel_graph[:, 0], (B, rel_graph.shape[2], ET))
  return jnp.transpose(pred_all, (0, 2, 1, 3)), rel_out


def _reference_forward(params, inputs, rel_rec, rel_send, pred_steps, *,
                       edge_types, skip_first):
  """Pure-JAX reference mirroring the PyTorch module (for correctness check)."""
  hp = jax.lax.Precision.HIGHEST
  x = jnp.transpose(inputs, (0, 2, 1, 3)).astype(jnp.float32)   # [B, T, N, D]
  B, T, N, D = x.shape
  H = params["w2"].shape[-1]
  relg = jax.nn.softmax(params["rel_graph"][0, 0], axis=-1)     # (E, ET)

  def single_step(s):
    recv = jnp.einsum('en,btnd->bted', rel_rec, s, precision=hp)
    send = jnp.einsum('en,btnd->bted', rel_send, s, precision=hp)
    pre = jnp.concatenate([send, recv], axis=-1)
    all_msgs = jnp.zeros(pre.shape[:-1] + (H,), jnp.float32)
    start = 1 if skip_first else 0
    for i in range(start, edge_types):
      m = jax.nn.relu(
          jnp.einsum('bted,dh->bteh', pre, params["w1"][i], precision=hp)
          + params["b1"][i])
      m = jax.nn.relu(
          jnp.einsum('bteh,hk->btek', m, params["w2"][i], precision=hp)
          + params["b2"][i])
      m = m * relg[:, i][None, None, :, None]
      all_msgs = all_msgs + m
    agg = jnp.einsum('en,bteh->btnh', rel_rec, all_msgs, precision=hp)
    aug = jnp.concatenate([s, agg], axis=-1)
    h = jax.nn.relu(
        jnp.einsum('btnf,fh->btnh', aug, params["wo1"], precision=hp)
        + params["bo1"])
    h = jax.nn.relu(
        jnp.einsum('btnh,hk->btnk', h, params["wo2"], precision=hp)
        + params["bo2"])
    pred = jnp.einsum('btnh,hd->btnd', h, params["wo3"], precision=hp) + params["bo3"]
    return s + pred

  last = x[:, 0::pred_steps]
  Tp = last.shape[1]
  preds = []
  for _ in range(pred_steps):
    last = single_step(last)
    preds.append(last)
  output = jnp.zeros((B, Tp * pred_steps, N, D), jnp.float32)
  for i in range(pred_steps):
    output = output.at[:, i::pred_steps].set(preds[i])
  pred_all = output[:, :T - 1]
  return jnp.transpose(pred_all, (0, 2, 1, 3))


def init_params(key, *, dims, edge_types, hidden, num_edges):
  """Deterministic parameter init (weights stored as (in, out), i.e. W^T)."""
  D, H, ET, E = dims, hidden, edge_types, num_edges
  keys = jax.random.split(key, 12)

  def lin(k, fan_in, fan_out):
    scale = 1.0 / jnp.sqrt(jnp.float32(fan_in))
    return jax.random.normal(k, (fan_in, fan_out), jnp.float32) * scale

  xavier_std = jnp.sqrt(2.0 / jnp.float32(E + ET))
  params = {
      "rel_graph": jax.random.normal(keys[0], (1, 1, E, ET), jnp.float32)
                   * xavier_std,
      "w1": jnp.stack([lin(k, 2 * D, H) for k in jax.random.split(keys[1], ET)]),
      "b1": jax.random.normal(keys[2], (ET, 1, H), jnp.float32) * 0.01,
      "w2": jnp.stack([lin(k, H, H) for k in jax.random.split(keys[3], ET)]),
      "b2": jax.random.normal(keys[4], (ET, 1, H), jnp.float32) * 0.01,
      "wo1": lin(keys[5], D + H, H),
      "bo1": jax.random.normal(keys[6], (1, H), jnp.float32) * 0.01,
      "wo2": lin(keys[7], H, H),
      "bo2": jax.random.normal(keys[8], (1, H), jnp.float32) * 0.01,
      "wo3": lin(keys[9], H, D),
      "bo3": jax.random.normal(keys[10], (1, D), jnp.float32) * 0.01,
  }
  return params


if __name__ == "__main__":
  # args: dims=4, edge_types=3, decoder_hidden=32, num_atoms=4,
  #       self_loop=False, skip_first=False, decoder_dropout=0.0
  B, N, T, D = 2, 4, 8, 4
  H, ET = 32, 3
  pred_steps = 2
  skip_first = False
  E = N * (N - 1)

  key = jax.random.PRNGKey(0)
  k_in, k_par = jax.random.split(key)

  inputs = jax.random.normal(k_in, (B, N, T, D), jnp.float32)

  # rel_rec / rel_send: one-hot receiver/sender matrices over off-diagonal edges
  off_diag = jnp.ones((N, N), jnp.float32) - jnp.eye(N, dtype=jnp.float32)
  recv_idx, send_idx = jnp.nonzero(off_diag, size=E)
  rel_rec = jax.nn.one_hot(recv_idx, N, dtype=jnp.float32)   # (E, N)
  rel_send = jax.nn.one_hot(send_idx, N, dtype=jnp.float32)  # (E, N)

  params = init_params(k_par, dims=D, edge_types=ET, hidden=H, num_edges=E)

  pred_all, rel_graph_out = mlp_decoder_causal_forward(
      params, inputs, rel_rec, rel_send, tau=0.5, hard=False,
      pred_steps=pred_steps, edge_types=ET, skip_first=skip_first)

  pred_all = jax.block_until_ready(pred_all)
  rel_graph_out = jax.block_until_ready(rel_graph_out)

  assert pred_all.shape == (B, N, T - 1, D), pred_all.shape
  assert rel_graph_out.shape == (B, E, ET), rel_graph_out.shape
  assert bool(jnp.all(jnp.isfinite(pred_all)))

  # Cross-check the packed/fused kernel against a straightforward JAX reference.
  ref = jax.block_until_ready(
      _reference_forward(params, inputs, rel_rec, rel_send, pred_steps,
                         edge_types=ET, skip_first=skip_first))
  assert jnp.allclose(pred_all, ref, rtol=1e-2, atol=1e-2), (
      float(jnp.max(jnp.abs(pred_all - ref))))

  print("KERNEL_OK")
</pallas_src>

<mosaic_0001>
module attributes {stable_mosaic.version = 11 : i64} {
  func.func @_decoder_kernel(%arg0: memref<32x4xf32, #tpu.memory_space<vmem>>, %arg1: memref<96x32xf32, #tpu.memory_space<vmem>>, %arg2: memref<96x32xf32, #tpu.memory_space<vmem>>, %arg3: memref<32x96xf32, #tpu.memory_space<vmem>>, %arg4: memref<96x96xf32, #tpu.memory_space<vmem>>, %arg5: memref<4x96xf32, #tpu.memory_space<vmem>>, %arg6: memref<4x96xf32, #tpu.memory_space<vmem>>, %arg7: memref<1x96xf32, #tpu.memory_space<vmem>>, %arg8: memref<96x96xf32, #tpu.memory_space<vmem>>, %arg9: memref<1x96xf32, #tpu.memory_space<vmem>>, %arg10: memref<96x32xf32, #tpu.memory_space<vmem>>, %arg11: memref<4x32xf32, #tpu.memory_space<vmem>>, %arg12: memref<32x32xf32, #tpu.memory_space<vmem>>, %arg13: memref<1x32xf32, #tpu.memory_space<vmem>>, %arg14: memref<32x32xf32, #tpu.memory_space<vmem>>, %arg15: memref<1x32xf32, #tpu.memory_space<vmem>>, %arg16: memref<32x4xf32, #tpu.memory_space<vmem>>, %arg17: memref<1x4xf32, #tpu.memory_space<vmem>>, %arg18: memref<2x32x4xf32, #tpu.memory_space<vmem>>) attributes {dimension_semantics = [], scalar_prefetch = 0 : i64, scratch_operands = 0 : i64, tpu.core_type = #tpu.core_type<tc>} {
    %c0 = arith.constant 0 : index
    %c0_0 = arith.constant 0 : index
    %0 = vector.load %arg0[%c0, %c0_0] : memref<32x4xf32, #tpu.memory_space<vmem>>, vector<32x4xf32>
    %c0_1 = arith.constant 0 : index
    %c0_2 = arith.constant 0 : index
    %1 = vector.load %arg1[%c0_1, %c0_2] : memref<96x32xf32, #tpu.memory_space<vmem>>, vector<96x32xf32>
    %c0_3 = arith.constant 0 : index
    %c0_4 = arith.constant 0 : index
    %2 = vector.load %arg2[%c0_3, %c0_4] : memref<96x32xf32, #tpu.memory_space<vmem>>, vector<96x32xf32>
    %c0_5 = arith.constant 0 : index
    %c0_6 = arith.constant 0 : index
    %3 = vector.load %arg3[%c0_5, %c0_6] : memref<32x96xf32, #tpu.memory_space<vmem>>, vector<32x96xf32>
    %c0_7 = arith.constant 0 : index
    %c0_8 = arith.constant 0 : index
    %4 = vector.load %arg4[%c0_7, %c0_8] : memref<96x96xf32, #tpu.memory_space<vmem>>, vector<96x96xf32>
    %c0_9 = arith.constant 0 : index
    %c0_10 = arith.constant 0 : index
    %5 = vector.load %arg5[%c0_9, %c0_10] : memref<4x96xf32, #tpu.memory_space<vmem>>, vector<4x96xf32>
    %c0_11 = arith.constant 0 : index
    %c0_12 = arith.constant 0 : index
    %6 = vector.load %arg6[%c0_11, %c0_12] : memref<4x96xf32, #tpu.memory_space<vmem>>, vector<4x96xf32>
    %c0_13 = arith.constant 0 : index
    %c0_14 = arith.constant 0 : index
    %7 = vector.load %arg7[%c0_13, %c0_14] : memref<1x96xf32, #tpu.memory_space<vmem>>, vector<1x96xf32>
    %c0_15 = arith.constant 0 : index
    %c0_16 = arith.constant 0 : index
    %8 = vector.load %arg8[%c0_15, %c0_16] : memref<96x96xf32, #tpu.memory_space<vmem>>, vector<96x96xf32>
    %c0_17 = arith.constant 0 : index
    %c0_18 = arith.constant 0 : index
    %9 = vector.load %arg9[%c0_17, %c0_18] : memref<1x96xf32, #tpu.memory_space<vmem>>, vector<1x96xf32>
    %c0_19 = arith.constant 0 : index
    %c0_20 = arith.constant 0 : index
    %10 = vector.load %arg10[%c0_19, %c0_20] : memref<96x32xf32, #tpu.memory_space<vmem>>, vector<96x32xf32>
    %c0_21 = arith.constant 0 : index
    %c0_22 = arith.constant 0 : index
    %11 = vector.load %arg11[%c0_21, %c0_22] : memref<4x32xf32, #tpu.memory_space<vmem>>, vector<4x32xf32>
    %c0_23 = arith.constant 0 : index
    %c0_24 = arith.constant 0 : index
    %12 = vector.load %arg12[%c0_23, %c0_24] : memref<32x32xf32, #tpu.memory_space<vmem>>, vector<32x32xf32>
    %c0_25 = arith.constant 0 : index
    %c0_26 = arith.constant 0 : index
    %13 = vector.load %arg13[%c0_25, %c0_26] : memref<1x32xf32, #tpu.memory_space<vmem>>, vector<1x32xf32>
    %c0_27 = arith.constant 0 : index
    %c0_28 = arith.constant 0 : index
    %14 = vector.load %arg14[%c0_27, %c0_28] : memref<32x32xf32, #tpu.memory_space<vmem>>, vector<32x32xf32>
    %c0_29 = arith.constant 0 : index
    %c0_30 = arith.constant 0 : index
    %15 = vector.load %arg15[%c0_29, %c0_30] : memref<1x32xf32, #tpu.memory_space<vmem>>, vector<1x32xf32>
    %c0_31 = arith.constant 0 : index
    %c0_32 = arith.constant 0 : index
    %16 = vector.load %arg16[%c0_31, %c0_32] : memref<32x4xf32, #tpu.memory_space<vmem>>, vector<32x4xf32>
    %c0_33 = arith.constant 0 : index
    %c0_34 = arith.constant 0 : index
    %17 = vector.load %arg17[%c0_33, %c0_34] : memref<1x4xf32, #tpu.memory_space<vmem>>, vector<1x4xf32>
    %cst = arith.constant dense<0.000000e+00> : vector<96x4xf32>
    %18 = tpu.matmul %1, %0, %cst {dimension_numbers = #tpu.dot_dimension_numbers<[1], [0], [0], [1], [0, 0, 1, 1], [], []>} : vector<96x32xf32>, vector<32x4xf32>, vector<96x4xf32> -> vector<96x4xf32>
    %cst_35 = arith.constant dense<0.000000e+00> : vector<96x4xf32>
    %19 = tpu.matmul %2, %0, %cst_35 {dimension_numbers = #tpu.dot_dimension_numbers<[1], [0], [0], [1], [0, 0, 1, 1], [], []>} : vector<96x32xf32>, vector<32x4xf32>, vector<96x4xf32> -> vector<96x4xf32>
    %cst_36 = arith.constant dense<0.000000e+00> : vector<96x96xf32>
    %20 = tpu.matmul %19, %5, %cst_36 {dimension_numbers = #tpu.dot_dimension_numbers<[1], [0], [0], [1], [0, 0, 1, 1], [], []>} : vector<96x4xf32>, vector<4x96xf32>, vector<96x96xf32> -> vector<96x96xf32>
    %cst_37 = arith.constant dense<0.000000e+00> : vector<96x96xf32>
    %21 = tpu.matmul %18, %6, %cst_37 {dimension_numbers = #tpu.dot_dimension_numbers<[1], [0], [0], [1], [0, 0, 1, 1], [], []>} : vector<96x4xf32>, vector<4x96xf32>, vector<96x96xf32> -> vector<96x96xf32>
    %22 = arith.addf %20, %21 : vector<96x96xf32>
    %23 = vector.broadcast %7 : vector<1x96xf32> to vector<96x96xf32>
    %24 = arith.addf %22, %23 : vector<96x96xf32>
    %cst_38 = arith.constant 0.000000e+00 : f32
    %25 = vector.broadcast %cst_38 : f32 to vector<96x96xf32>
    %26 = arith.maximumf %24, %25 : vector<96x96xf32>
    %cst_39 = arith.constant dense<0.000000e+00> : vector<96x96xf32>
    %27 = tpu.matmul %26, %8, %cst_39 {dimension_numbers = #tpu.dot_dimension_numbers<[1], [0], [0], [1], [0, 0, 1, 1], [], []>} : vector<96x96xf32>, vector<96x96xf32>, vector<96x96xf32> -> vector<96x96xf32>
    %28 = vector.broadcast %9 : vector<1x96xf32> to vector<96x96xf32>
    %29 = arith.addf %27, %28 : vector<96x96xf32>
    %cst_40 = arith.constant 0.000000e+00 : f32
    %30 = vector.broadcast %cst_40 : f32 to vector<96x96xf32>
    %31 = arith.maximumf %29, %30 : vector<96x96xf32>
    %32 = arith.mulf %31, %4 : vector<96x96xf32>
    %cst_41 = arith.constant dense<0.000000e+00> : vector<96x32xf32>
    %33 = tpu.matmul %32, %10, %cst_41 {dimension_numbers = #tpu.dot_dimension_numbers<[1], [0], [0], [1], [0, 0, 1, 1], [], []>} : vector<96x96xf32>, vector<96x32xf32>, vector<96x32xf32> -> vector<96x32xf32>
    %cst_42 = arith.constant dense<0.000000e+00> : vector<32x32xf32>
    %34 = tpu.matmul %3, %33, %cst_42 {dimension_numbers = #tpu.dot_dimension_numbers<[1], [0], [0], [1], [0, 0, 1, 1], [], []>} : vector<32x96xf32>, vector<96x32xf32>, vector<32x32xf32> -> vector<32x32xf32>
    %cst_43 = arith.constant dense<0.000000e+00> : vector<32x32xf32>
    %35 = tpu.matmul %0, %11, %cst_43 {dimension_numbers = #tpu.dot_dimension_numbers<[1], [0], [0], [1], [0, 0, 1, 1], [], []>} : vector<32x4xf32>, vector<4x32xf32>, vector<32x32xf32> -> vector<32x32xf32>
    %cst_44 = arith.constant dense<0.000000e+00> : vector<32x32xf32>
    %36 = tpu.matmul %34, %12, %cst_44 {dimension_numbers = #tpu.dot_dimension_numbers<[1], [0], [0], [1], [0, 0, 1, 1], [], []>} : vector<32x32xf32>, vector<32x32xf32>, vector<32x32xf32> -> vector<32x32xf32>
    %37 = arith.addf %35, %36 : vector<32x32xf32>
    %38 = vector.broadcast %13 : vector<1x32xf32> to vector<32x32xf32>
    %39 = arith.addf %37, %38 : vector<32x32xf32>
    %cst_45 = arith.constant 0.000000e+00 : f32
    %40 = vector.broadcast %cst_45 : f32 to vector<32x32xf32>
    %41 = arith.maximumf %39, %40 : vector<32x32xf32>
    %cst_46 = arith.constant dense<0.000000e+00> : vector<32x32xf32>
    %42 = tpu.matmul %41, %14, %cst_46 {dimension_numbers = #tpu.dot_dimension_numbers<[1], [0], [0], [1], [0, 0, 1, 1], [], []>} : vector<32x32xf32>, vector<32x32xf32>, vector<32x32xf32> -> vector<32x32xf32>
    %43 = vector.broadcast %15 : vector<1x32xf32> to vector<32x32xf32>
    %44 = arith.addf %42, %43 : vector<32x32xf32>
    %cst_47 = arith.constant 0.000000e+00 : f32
    %45 = vector.broadcast %cst_47 : f32 to vector<32x32xf32>
    %46 = arith.maximumf %44, %45 : vector<32x32xf32>
    %cst_48 = arith.constant dense<0.000000e+00> : vector<32x4xf32>
    %47 = tpu.matmul %46, %16, %cst_48 {dimension_numbers = #tpu.dot_dimension_numbers<[1], [0], [0], [1], [0, 0, 1, 1], [], []>} : vector<32x32xf32>, vector<32x4xf32>, vector<32x4xf32> -> vector<32x4xf32>
    %48 = vector.broadcast %17 : vector<1x4xf32> to vector<32x4xf32>
    %49 = arith.addf %47, %48 : vector<32x4xf32>
    %50 = arith.addf %0, %49 : vector<32x4xf32>
    %c0_49 = arith.constant 0 : index
    %c0_50 = arith.constant 0 : index
    %c0_51 = arith.constant 0 : index
    %51 = vector.load %arg18[%c0_49, %c0_50, %c0_51] : memref<2x32x4xf32, #tpu.memory_space<vmem>>, vector<1x32x4xf32>
    %52 = vector.shape_cast %51 : vector<1x32x4xf32> to vector<32x4xf32>
    %53 = vector.shape_cast %50 : vector<32x4xf32> to vector<1x32x4xf32>
    tpu.vector_store %arg18[%c0_49, %c0_50, %c0_51], %53 {strides = array<i32>} : memref<2x32x4xf32, #tpu.memory_space<vmem>>, vector<1x32x4xf32>,
    %cst_52 = arith.constant dense<0.000000e+00> : vector<96x4xf32>
    %54 = tpu.matmul %1, %50, %cst_52 {dimension_numbers = #tpu.dot_dimension_numbers<[1], [0], [0], [1], [0, 0, 1, 1], [], []>} : vector<96x32xf32>, vector<32x4xf32>, vector<96x4xf32> -> vector<96x4xf32>
    %cst_53 = arith.constant dense<0.000000e+00> : vector<96x4xf32>
    %55 = tpu.matmul %2, %50, %cst_53 {dimension_numbers = #tpu.dot_dimension_numbers<[1], [0], [0], [1], [0, 0, 1, 1], [], []>} : vector<96x32xf32>, vector<32x4xf32>, vector<96x4xf32> -> vector<96x4xf32>
    %cst_54 = arith.constant dense<0.000000e+00> : vector<96x96xf32>
    %56 = tpu.matmul %55, %5, %cst_54 {dimension_numbers = #tpu.dot_dimension_numbers<[1], [0], [0], [1], [0, 0, 1, 1], [], []>} : vector<96x4xf32>, vector<4x96xf32>, vector<96x96xf32> -> vector<96x96xf32>
    %cst_55 = arith.constant dense<0.000000e+00> : vector<96x96xf32>
    %57 = tpu.matmul %54, %6, %cst_55 {dimension_numbers = #tpu.dot_dimension_numbers<[1], [0], [0], [1], [0, 0, 1, 1], [], []>} : vector<96x4xf32>, vector<4x96xf32>, vector<96x96xf32> -> vector<96x96xf32>
    %58 = arith.addf %56, %57 : vector<96x96xf32>
    %59 = vector.broadcast %7 : vector<1x96xf32> to vector<96x96xf32>
    %60 = arith.addf %58, %59 : vector<96x96xf32>
    %cst_56 = arith.constant 0.000000e+00 : f32
    %61 = vector.broadcast %cst_56 : f32 to vector<96x96xf32>
    %62 = arith.maximumf %60, %61 : vector<96x96xf32>
    %cst_57 = arith.constant dense<0.000000e+00> : vector<96x96xf32>
    %63 = tpu.matmul %62, %8, %cst_57 {dimension_numbers = #tpu.dot_dimension_numbers<[1], [0], [0], [1], [0, 0, 1, 1], [], []>} : vector<96x96xf32>, vector<96x96xf32>, vector<96x96xf32> -> vector<96x96xf32>
    %64 = vector.broadcast %9 : vector<1x96xf32> to vector<96x96xf32>
    %65 = arith.addf %63, %64 : vector<96x96xf32>
    %cst_58 = arith.constant 0.000000e+00 : f32
    %66 = vector.broadcast %cst_58 : f32 to vector<96x96xf32>
    %67 = arith.maximumf %65, %66 : vector<96x96xf32>
    %68 = arith.mulf %67, %4 : vector<96x96xf32>
    %cst_59 = arith.constant dense<0.000000e+00> : vector<96x32xf32>
    %69 = tpu.matmul %68, %10, %cst_59 {dimension_numbers = #tpu.dot_dimension_numbers<[1], [0], [0], [1], [0, 0, 1, 1], [], []>} : vector<96x96xf32>, vector<96x32xf32>, vector<96x32xf32> -> vector<96x32xf32>
    %cst_60 = arith.constant dense<0.000000e+00> : vector<32x32xf32>
    %70 = tpu.matmul %3, %69, %cst_60 {dimension_numbers = #tpu.dot_dimension_numbers<[1], [0], [0], [1], [0, 0, 1, 1], [], []>} : vector<32x96xf32>, vector<96x32xf32>, vector<32x32xf32> -> vector<32x32xf32>
    %cst_61 = arith.constant dense<0.000000e+00> : vector<32x32xf32>
    %71 = tpu.matmul %50, %11, %cst_61 {dimension_numbers = #tpu.dot_dimension_numbers<[1], [0], [0], [1], [0, 0, 1, 1], [], []>} : vector<32x4xf32>, vector<4x32xf32>, vector<32x32xf32> -> vector<32x32xf32>
    %cst_62 = arith.constant dense<0.000000e+00> : vector<32x32xf32>
    %72 = tpu.matmul %70, %12, %cst_62 {dimension_numbers = #tpu.dot_dimension_numbers<[1], [0], [0], [1], [0, 0, 1, 1], [], []>} : vector<32x32xf32>, vector<32x32xf32>, vector<32x32xf32> -> vector<32x32xf32>
    %73 = arith.addf %71, %72 : vector<32x32xf32>
    %74 = vector.broadcast %13 : vector<1x32xf32> to vector<32x32xf32>
    %75 = arith.addf %73, %74 : vector<32x32xf32>
    %cst_63 = arith.constant 0.000000e+00 : f32
    %76 = vector.broadcast %cst_63 : f32 to vector<32x32xf32>
    %77 = arith.maximumf %75, %76 : vector<32x32xf32>
    %cst_64 = arith.constant dense<0.000000e+00> : vector<32x32xf32>
    %78 = tpu.matmul %77, %14, %cst_64 {dimension_numbers = #tpu.dot_dimension_numbers<[1], [0], [0], [1], [0, 0, 1, 1], [], []>} : vector<32x32xf32>, vector<32x32xf32>, vector<32x32xf32> -> vector<32x32xf32>
    %79 = vector.broadcast %15 : vector<1x32xf32> to vector<32x32xf32>
    %80 = arith.addf %78, %79 : vector<32x32xf32>
    %cst_65 = arith.constant 0.000000e+00 : f32
    %81 = vector.broadcast %cst_65 : f32 to vector<32x32xf32>
    %82 = arith.maximumf %80, %81 : vector<32x32xf32>
    %cst_66 = arith.constant dense<0.000000e+00> : vector<32x4xf32>
    %83 = tpu.matmul %82, %16, %cst_66 {dimension_numbers = #tpu.dot_dimension_numbers<[1], [0], [0], [1], [0, 0, 1, 1], [], []>} : vector<32x32xf32>, vector<32x4xf32>, vector<32x4xf32> -> vector<32x4xf32>
    %84 = vector.broadcast %17 : vector<1x4xf32> to vector<32x4xf32>
    %85 = arith.addf %83, %84 : vector<32x4xf32>
    %86 = arith.addf %50, %85 : vector<32x4xf32>
    %c1 = arith.constant 1 : index
    %c0_67 = arith.constant 0 : index
    %c0_68 = arith.constant 0 : index
    %87 = vector.load %arg18[%c1, %c0_67, %c0_68] : memref<2x32x4xf32, #tpu.memory_space<vmem>>, vector<1x32x4xf32>
    %88 = vector.shape_cast %87 : vector<1x32x4xf32> to vector<32x4xf32>
    %89 = vector.shape_cast %86 : vector<32x4xf32> to vector<1x32x4xf32>
    tpu.vector_store %arg18[%c1, %c0_67, %c0_68], %89 {strides = array<i32>} : memref<2x32x4xf32, #tpu.memory_space<vmem>>, vector<1x32x4xf32>,
    return
  }
}

</mosaic_0001>

<bundles_post_ra>
// kernel: tpu_custom_call.1
= control target key start
LH: loop header
LB: loop body
LE: loop exit
PB: predicated region body
PF: predicated region fallthrough
CT: control target
= control target key end

     0   :  { %vm147_vm0 = vcmask 261120   ;;  %vm507_vm1 = vcmask 1043456   ;;  %vm470_vm2 = vcmask 31744   ;;  %vm836_vm3 = vcmask 785408   ;;  %s5417_s0 = inlined_call_operand.vmem [shape: f32[32,4], index: 0, kind: input, shape index: {}]   ;;  %s5418_s1 = inlined_call_operand.vmem [shape: f32[96,32], index: 1, kind: input, shape index: {}]   ;;  %s5419_s2 = inlined_call_operand.vmem [shape: f32[96,32], index: 2, kind: input, shape index: {}]   ;;  %s5420_s6 = inlined_call_operand.vmem [shape: f32[4,96], index: 6, kind: input, shape index: {}]   ;;  %s5421_s5 = inlined_call_operand.vmem [shape: f32[4,96], index: 5, kind: input, shape index: {}]   ;;  %s5422_s8 = inlined_call_operand.vmem [shape: f32[96,96], index: 8, kind: input, shape index: {}]   ;;  %s5423_s10 = inlined_call_operand.vmem [shape: f32[96,32], index: 10, kind: input, shape index: {}]   ;;  %s5424_s7 = inlined_call_operand.vmem [shape: f32[1,96], index: 7, kind: input, shape index: {}]   ;;  %s5425_s9 = inlined_call_operand.vmem [shape: f32[1,96], index: 9, kind: input, shape index: {}]   ;;  %s5426_s4 = inlined_call_operand.vmem [shape: f32[96,96], index: 4, kind: input, shape index: {}]   ;;  %s5427_s3 = inlined_call_operand.vmem [shape: f32[32,96], index: 3, kind: input, shape index: {}]   ;;  %s5428_s12 = inlined_call_operand.vmem [shape: f32[32,32], index: 12, kind: input, shape index: {}]   ;;  %s5429_s11 = inlined_call_operand.vmem [shape: f32[4,32], index: 11, kind: input, shape index: {}]   ;;  %s5430_s14 = inlined_call_operand.vmem [shape: f32[32,32], index: 14, kind: input, shape index: {}]   ;;  %s5431_s16 = inlined_call_operand.vmem [shape: f32[32,4], index: 16, kind: input, shape index: {}]   ;;  %s5432_s13 = inlined_call_operand.vmem [shape: f32[1,32], index: 13, kind: input, shape index: {}]   ;;  %s5433_s15 = inlined_call_operand.vmem [shape: f32[1,32], index: 15, kind: input, shape index: {}]   ;;  %s5434_s17 = inlined_call_operand.vmem [shape: f32[1,4], index: 17, kind: input, shape index: {}]   ;;  %s5435_s18 = inlined_call_operand.vmem [shape: f32[2,32,4], index: 18, kind: output, shape index: {}]  }
   0x1   :  { %5459 = sst [smem:[#allocation18_spill]] %s5417_s0  ;;  %v4574_v12 = vld [vmem:[%s5420_s6] sm:$0xf]  ;;  %v107_v33 = vld [vmem:[%s5422_s8 + $0x8] sm:$0xff]  ;;  %v108_v34 = vld [vmem:[%s5422_s8 + $0x10] sm:$0xff] }
   0x2   :  { %5460 = sst [smem:[#allocation19_spill]] %s5418_s1  ;;  %s5462_s29 = sld [smem:[#allocation18_spill]]  ;;  %v4717_v31 = vld [vmem:[%s5421_s5] sm:$0xf]  ;;  %v109_v36 = vld [vmem:[%s5422_s8 + $0x18] sm:$0xff]  ;;  %v111_v39 = vld [vmem:[%s5422_s8 + $0x28] sm:$0xff] }
   0x3   :  { %5461 = sst [smem:[#allocation20_spill]] %s5419_s2  ;;  %s5463_s23 = sld [smem:[#allocation19_spill]]  ;;  %v106_v32 = vld [vmem:[%s5422_s8] sm:$0xff]  ;;  %v4735_v37 = vpack.c.bf16 %v109_v36, %v108_v34  ;;  %v112_v41 = vld [vmem:[%s5422_s8 + $0x30] sm:$0xff]  ;;  %v113_v42 = vld [vmem:[%s5422_s8 + $0x38] sm:$0xff] }
   0x4   :  { %s5464_s26 = sld [smem:[#allocation20_spill]]  ;;  %v4730_v35 = vpack.c.bf16 %v107_v33, %v106_v32  ;;  %v110_v38 = vld [vmem:[%s5422_s8 + $0x20] sm:$0xff]  ;;  %v4756_v43 = vpack.c.bf16 %v113_v42, %v112_v41  ;;  %v115_v45 = vld [vmem:[%s5422_s8 + $0x48] sm:$0xff]  ;;  %v117_v41 = vld [vmem:[%s5422_s8 + $0x58] sm:$0xff] }
   0x5   :  { %v4746_v40 = vpack.c.bf16 %v111_v39, %v110_v38  ;;  %v114_v44 = vld [vmem:[%s5422_s8 + $0x40] sm:$0xff]  ;;  %v116_v39 = vld [vmem:[%s5422_s8 + $0x50] sm:$0xff] }
   0x6   :  { %v4766_v46 = vpack.c.bf16 %v115_v45, %v114_v44  ;;  %v4803_v42 = vpack.c.bf16 %v117_v41, %v116_v39  ;;  %v119_v44 = vld [vmem:[%s5423_s10] sm:$0xff]  ;;  %v120_v45 = vld [vmem:[%s5423_s10 + $0x8] sm:$0xff]  ;;  %v125_v39 = vld [vmem:[%s5423_s10 + $0x30] sm:$0xff] }
   0x7   :  { %v126_v41 = vld [vmem:[%s5423_s10 + $0x38] sm:$0xff] }
   0x8   :  { %v4516_v0 = vld [vmem:[%s5462_s29] sm:$0xff]  ;;  %v4521_v1 = vld [vmem:[%s5462_s29 + $0x8] sm:$0xff]  ;;  %v4526_v2 = vld [vmem:[%s5462_s29 + $0x10] sm:$0xff] }
   0x9   :  { %v4162_v3 = vpack.c.bf16 %v4521_v1, %v4516_v0  ;;  %v4533_v4 = vld [vmem:[%s5462_s29 + $0x18] sm:$0xff]  ;;  %v4538_v5 = vld [vmem:[%s5463_s23] sm:$0xff]  ;;  %v4554_v8 = vld [vmem:[%s5463_s23 + $0x8] sm:$0xff] }
   0xa   :  { %v4166_v6 = vpack.c.bf16 %v4533_v4, %v4526_v2  ;;  %3658 = vmatprep.mubr.msk.f32.mxu0 %vm147_vm0, %v4538_v5  ;;  %v4547_v7 = vld [vmem:[%s5464_s26] sm:$0xff]  ;;  %v4559_v9 = vld [vmem:[%s5464_s26 + $0x8] sm:$0xff]  ;;  %v4564_v10 = vld [vmem:[%s5463_s23 + $0x10] sm:$0xff] }
   0xb   :  { %4163 = vmatprep.subr.bf16.mxu0 %v4162_v3  ;;  %4171 = vmatprep.subr.bf16.mxu1 %v4162_v3  ;;  %v4569_v11 = vld [vmem:[%s5464_s26 + $0x10] sm:$0xff]  ;;  %v4587_v13 = vld [vmem:[%s5463_s23 + $0x18] sm:$0xff]  ;;  %v4599_v15 = vld [vmem:[%s5463_s23 + $0x20] sm:$0xff] }
   0xc   :  { %4165 = vmatpush3.bf16.msra.mxu0 %v4162_v3  ;;  %4173 = vmatpush3.bf16.msra.mxu1 %v4162_v3  ;;  %v4594_v14 = vld [vmem:[%s5464_s26 + $0x18] sm:$0xff]  ;;  %v4604_v16 = vld [vmem:[%s5464_s26 + $0x20] sm:$0xff]  ;;  %v4617_v17 = vld [vmem:[%s5463_s23 + $0x28] sm:$0xff] }
   0xd   :  { %4167 = vmatprep.subr.bf16.mxu0 %v4166_v6  ;;  %4175 = vmatprep.subr.bf16.mxu1 %v4166_v6  ;;  %v4624_v18 = vld [vmem:[%s5464_s26 + $0x28] sm:$0xff]  ;;  %v4629_v19 = vld [vmem:[%s5463_s23 + $0x30] sm:$0xff]  ;;  %v4645_v21 = vld [vmem:[%s5463_s23 + $0x38] sm:$0xff] }
   0xe   :  { %3684 = vmatprep.mubr.msk.f32.mxu1 %vm147_vm0, %v4547_v7  ;;  %v4634_v20 = vld [vmem:[%s5464_s26 + $0x30] sm:$0xff]  ;;  %v4652_v22 = vld [vmem:[%s5464_s26 + $0x38] sm:$0xff]  ;;  %v4657_v23 = vld [vmem:[%s5463_s23 + $0x40] sm:$0xff] }
   0xf   :  { %v4662_v24 = vld [vmem:[%s5464_s26 + $0x40] sm:$0xff]  ;;  %v4673_v25 = vld [vmem:[%s5463_s23 + $0x48] sm:$0xff]  ;;  %v4685_v27 = vld [vmem:[%s5463_s23 + $0x50] sm:$0xff] }
  0x10   :  { %4169 = vmatpush3.bf16.msra.mxu0 %v4166_v6  ;;  %4177 = vmatpush3.bf16.msra.mxu1 %v4166_v6  ;;  %v4680_v26 = vld [vmem:[%s5464_s26 + $0x48] sm:$0xff]  ;;  %v4690_v28 = vld [vmem:[%s5464_s26 + $0x50] sm:$0xff]  ;;  %v4701_v29 = vld [vmem:[%s5463_s23 + $0x58] sm:$0xff] }
  0x11   :  { %3702 = vmatprep.subr.msk.mxu0 %vm507_vm1, %v4574_v12  ;;  %v4708_v30 = vld [vmem:[%s5464_s26 + $0x58] sm:$0xff]  ;;  %4179 = vmatprep.subr.bf16.mxu1 %v4730_v35 }
  0x13   :  { %3659 = vmatmul.mubr.msk.f32.vlgmr.msra.gmra.mrb[0].mxu0 %vm147_vm0, %v4554_v8  ;;  %3685 = vmatmul.mubr.msk.f32.vlgmr.msra.gmra.mrb[0].mxu1 %vm147_vm0, %v4559_v9 }
  0x14   :  { %3661 = vmatprep.mubr.msk.f32.mxu0 %vm147_vm0, %v4564_v10  ;;  %3687 = vmatprep.mubr.msk.f32.mxu1 %vm147_vm0, %v4569_v11 }
  0x15   :  { %3703 = vmatpush3.msk.msra.mxu0 %vm507_vm1, %v4574_v12  ;;  %4181 = vmatpush3.bf16.msra.mxu1 %v4730_v35 }
  0x16   :  { %3722 = vmatprep.subr.msk.mxu0 %vm507_vm1, %v4717_v31  ;;  %4183 = vmatprep.subr.bf16.mxu1 %v4735_v37 }
  0x17   :  { %3662 = vmatmul.mubr.msk.f32.gmra.mrb[2].mxu0 %vm147_vm0, %v4587_v13  ;;  %3688 = vmatmul.mubr.msk.f32.gmra.mrb[2].mxu1 %vm147_vm0, %v4594_v14 }
  0x18   :  { %3664 = vmatprep.mubr.msk.f32.mxu0 %vm147_vm0, %v4599_v15  ;;  %3690 = vmatprep.mubr.msk.f32.mxu1 %vm147_vm0, %v4604_v16 }
  0x19   :  { %4185 = vmatpush3.bf16.msra.mxu1 %v4735_v37 }
  0x1a   :  { %4187 = vmatprep.subr.bf16.mxu1 %v4746_v40 }
  0x1b   :  { %3665 = vmatmul.mubr.msk.f32.gmra.mrb[4].mxu0 %vm147_vm0, %v4617_v17  ;;  %3691 = vmatmul.mubr.msk.f32.gmra.mrb[4].mxu1 %vm147_vm0, %v4624_v18 }
  0x1c   :  { %3667 = vmatprep.mubr.msk.f32.mxu0 %vm147_vm0, %v4629_v19  ;;  %3693 = vmatprep.mubr.msk.f32.mxu1 %vm147_vm0, %v4634_v20 }
  0x1d   :  { %4189 = vmatpush3.bf16.msra.mxu1 %v4746_v40 }
  0x1e   :  { %4191 = vmatprep.subr.bf16.mxu1 %v4756_v43 }
  0x1f   :  { %3668 = vmatmul.mubr.msk.f32.gmra.mrb[6].mxu0 %vm147_vm0, %v4645_v21  ;;  %3694 = vmatmul.mubr.msk.f32.gmra.mrb[6].mxu1 %vm147_vm0, %v4652_v22 }
  0x20   :  { %3670 = vmatprep.mubr.msk.f32.mxu0 %vm147_vm0, %v4657_v23  ;;  %3696 = vmatprep.mubr.msk.f32.mxu1 %vm147_vm0, %v4662_v24 }
  0x21   :  { %4193 = vmatpush3.bf16.msra.mxu1 %v4756_v43 }
  0x22   :  { %4195 = vmatprep.subr.bf16.mxu1 %v4766_v46 }
  0x23   :  { %3671 = vmatmul.mubr.msk.f32.gmra.mrb[8].mxu0 %vm147_vm0, %v4673_v25  ;;  %3697 = vmatmul.mubr.msk.f32.gmra.mrb[8].mxu1 %vm147_vm0, %v4680_v26 }
  0x24   :  { %3673 = vmatprep.mubr.msk.f32.mxu0 %vm147_vm0, %v4685_v27  ;;  %3699 = vmatprep.mubr.msk.f32.mxu1 %vm147_vm0, %v4690_v28 }
  0x25   :  { %4197 = vmatpush3.bf16.msra.mxu1 %v4766_v46 }
  0x26   :  { %4199 = vmatprep.subr.bf16.mxu1 %v4803_v42 }
  0x27   :  { %3674 = vmatmul.mubr.msk.f32.gmra.mrb[10].mxu0 %vm147_vm0, %v4701_v29  ;;  %3700 = vmatmul.mubr.msk.f32.gmra.mrb[10].mxu1 %vm147_vm0, %v4708_v30 }
  0x29   :  { %4201 = vmatpush3.bf16.msra.mxu1 %v4803_v42 }
  0xe6   :  { %v3660_v47 = vpop.f32.mrb[0].mxu0  ;;  %v3686_v48 = vpop.f32.mrb[0].mxu1 }
  0xe7   :  { %v250_v49 = vpop.f32.mrb[1].mxu0  ;;  %v411_v50 = vpop.f32.mrb[1].mxu1 }
  0xe8   :  { %3704 = vmatprep.mubr.msk.f32.mxu0 %vm470_vm2, %v250_v49 }
  0xe9   :  { %3705 = vmatmul.mubr.msk.f32.vlgmr.msra.gmra.mrb[12].mxu0 %vm470_vm2, %v3660_v47  ;;  %v4813_v47 = vpack.c.bf16 %v120_v45, %v119_v44 }
  0xea   :  { %v3663_v51 = vpop.f32.mrb[2].mxu0  ;;  %3723 = vmatpush3.msk.msra.mxu0 %vm507_vm1, %v4717_v31  ;;  %v3689_v52 = vpop.f32.mrb[2].mxu1 }
  0xeb   :  { %v260_v53 = vpop.f32.mrb[3].mxu0  ;;  %v421_v54 = vpop.f32.mrb[3].mxu1  ;;  %4203 = vmatprep.subr.bf16.mxu1 %v4813_v47 }
  0xec   :  { %3707 = vmatprep.mubr.msk.f32.mxu0 %vm470_vm2, %v260_v53  ;;  %v121_v53 = vld [vmem:[%s5423_s10 + $0x10] sm:$0xff] }
  0xed   :  { %3708 = vmatmul.mubr.msk.f32.gmra.mrb[14].mxu0 %vm470_vm2, %v3663_v51 }
  0xee   :  { %v3666_v55 = vpop.f32.mrb[4].mxu0  ;;  %v3692_v56 = vpop.f32.mrb[4].mxu1 }
  0xef   :  { %v270_v57 = vpop.f32.mrb[5].mxu0  ;;  %v431_v58 = vpop.f32.mrb[5].mxu1 }
  0xf0   :  { %3710 = vmatprep.mubr.msk.f32.mxu0 %vm470_vm2, %v270_v57 }
  0xf1   :  { %3711 = vmatmul.mubr.msk.f32.gmra.mrb[16].mxu0 %vm470_vm2, %v3666_v55 }
  0xf2   :  { %v3669_v59 = vpop.f32.mrb[6].mxu0  ;;  %v3695_v60 = vpop.f32.mrb[6].mxu1 }
  0xf3   :  { %v280_v61 = vpop.f32.mrb[7].mxu0  ;;  %v441_v62 = vpop.f32.mrb[7].mxu1 }
  0xf4   :  { %3713 = vmatprep.mubr.msk.f32.mxu0 %vm470_vm2, %v280_v61 }
  0xf5   :  { %3714 = vmatmul.mubr.msk.f32.gmra.mrb[18].mxu0 %vm470_vm2, %v3669_v59 }
  0xf6   :  { %v3672_v63 = vpop.f32.mrb[8].mxu0  ;;  %v3698_v3 = vpop.f32.mrb[8].mxu1 }
  0xf7   :  { %v290_v6 = vpop.f32.mrb[9].mxu0  ;;  %v451_v32 = vpop.f32.mrb[9].mxu1 }
  0xf8   :  { %3716 = vmatprep.mubr.msk.f32.mxu0 %vm470_vm2, %v290_v6 }
  0xf9   :  { %3717 = vmatmul.mubr.msk.f32.gmra.mrb[20].mxu0 %vm470_vm2, %v3672_v63  ;;  %v124_v63 = vld [vmem:[%s5423_s10 + $0x28] sm:$0xff] }
  0xfa   :  { %v3675_v33 = vpop.f32.mrb[10].mxu0  ;;  %v3701_v34 = vpop.f32.mrb[10].mxu1 }
  0xfb   :  { %v300_v36 = vpop.f32.mrb[11].mxu0  ;;  %v461_v38 = vpop.f32.mrb[11].mxu1 }
  0xfc   :  { %3719 = vmatprep.mubr.msk.f32.mxu0 %vm470_vm2, %v300_v36 }
  0xfd   :  { %3720 = vmatmul.mubr.msk.f32.gmra.mrb[22].mxu0 %vm470_vm2, %v3675_v33 }
  0xfe   :  { %3724 = vmatprep.mubr.msk.f32.mxu0 %vm470_vm2, %v411_v50 }
 0x101   :  { %3725 = vmatmul.mubr.msk.f32.vlgmr.msra.gmra.mrb[12].mxu0 %vm470_vm2, %v3686_v48  ;;  %v4819_v48 = vld [vmem:[%s5424_s7] ss:$0 sm:$0xff] }
 0x102   :  { %3727 = vmatprep.mubr.msk.f32.mxu0 %vm470_vm2, %v421_v54  ;;  %v122_v54 = vld [vmem:[%s5423_s10 + $0x18] sm:$0xff] }
 0x105   :  { %3728 = vmatmul.mubr.msk.f32.gmra.mrb[14].mxu0 %vm470_vm2, %v3689_v52 }
 0x106   :  { %3730 = vmatprep.mubr.msk.f32.mxu0 %vm470_vm2, %v431_v58 }
 0x109   :  { %3731 = vmatmul.mubr.msk.f32.gmra.mrb[16].mxu0 %vm470_vm2, %v3692_v56 }
 0x10a   :  { %3733 = vmatprep.mubr.msk.f32.mxu0 %vm470_vm2, %v441_v62  ;;  %v123_v62 = vld [vmem:[%s5423_s10 + $0x20] sm:$0xff] }
 0x10b   :  { %v4844_v36 = vpack.c.bf16 %v124_v63, %v123_v62 }
 0x10d   :  { %3734 = vmatmul.mubr.msk.f32.gmra.mrb[18].mxu0 %vm470_vm2, %v3695_v60  ;;  %v4830_v60 = vpack.c.bf16 %v122_v54, %v121_v53 }
 0x10e   :  { %3736 = vmatprep.mubr.msk.f32.mxu0 %vm470_vm2, %v451_v32 }
 0x111   :  { %3737 = vmatmul.mubr.msk.f32.gmra.mrb[20].mxu0 %vm470_vm2, %v3698_v3 }
 0x112   :  { %3739 = vmatprep.mubr.msk.f32.mxu0 %vm470_vm2, %v461_v38 }
 0x115   :  { %3740 = vmatmul.mubr.msk.f32.gmra.mrb[22].mxu0 %vm470_vm2, %v3701_v34 }
 0x1d4   :  { %v3726_v49 = vpop.f32.mrb[12].mxu0 }
 0x1d5   :  { %v807_v50 = vadd.f32 %v3726_v49, %v4819_v48  ;;  %v741_v51 = vpop.f32.mrb[13].mxu0 }
 0x1d6   :  { %v806_v52 = vadd.f32 %v4819_v48, %v741_v51 }
 0x1d7   :  { %v819_v57 = vmax.f32 %v807_v50, 0.0 }
 0x1d8   :  { %v818_v55 = vmax.f32 %v806_v52, 0.0  ;;  %v3729_v56 = vpop.f32.mrb[14].mxu0  ;;  %v4858_v52 = vpack.c.bf16 %v126_v41, %v125_v39  ;;  %v128_v39 = vld [vmem:[%s5423_s10 + $0x48] sm:$0xff] }
 0x1d9   :  { %v809_v58 = vadd.f32 %v3729_v56, %v4819_v48  ;;  %v751_v59 = vpop.f32.mrb[15].mxu0 }
 0x1da   :  { %v808_v61 = vadd.f32 %v4819_v48, %v751_v59  ;;  %3766 = vmatprep.mubr.msk.f32.mxu1 %vm836_vm3, %v818_v55 }
 0x1db   :  { %3767 = vmatmul.mubr.msk.f32.vlgmr.msra.gmra.mrb[12].mxu1 %vm836_vm3, %v819_v57  ;;  %v821_v32 = vmax.f32 %v809_v58, 0.0 }
 0x1dc   :  { %v820_v3 = vmax.f32 %v808_v61, 0.0  ;;  %v3732_v6 = vpop.f32.mrb[16].mxu0  ;;  %4205 = vmatpush3.bf16.msra.mxu1 %v4813_v47 }
 0x1dd   :  { %v811_v33 = vadd.f32 %v3732_v6, %v4819_v48  ;;  %v761_v34 = vpop.f32.mrb[17].mxu0  ;;  %4207 = vmatprep.subr.bf16.mxu1 %v4830_v60 }
 0x1de   :  { %v810_v38 = vadd.f32 %v4819_v48, %v761_v34  ;;  %3769 = vmatprep.mubr.msk.f32.mxu1 %vm836_vm3, %v820_v3 }
 0x1df   :  { %3770 = vmatmul.mubr.msk.f32.gmra.mrb[14].mxu1 %vm836_vm3, %v821_v32  ;;  %v823_v49 = vmax.f32 %v811_v33, 0.0 }
 0x1e0   :  { %v822_v44 = vmax.f32 %v810_v38, 0.0  ;;  %v3735_v45 = vpop.f32.mrb[18].mxu0  ;;  %4209 = vmatpush3.bf16.msra.mxu1 %v4830_v60  ;;  %v127_v38 = vld [vmem:[%s5423_s10 + $0x40] sm:$0xff] }
 0x1e1   :  { %v813_v50 = vadd.f32 %v3735_v45, %v4819_v48  ;;  %v771_v51 = vpop.f32.mrb[19].mxu0  ;;  %4211 = vmatprep.subr.bf16.mxu1 %v4844_v36  ;;  %v4882_v41 = vpack.c.bf16 %v128_v39, %v127_v38  ;;  %v130_v45 = vld [vmem:[%s5423_s10 + $0x58] sm:$0xff] }
 0x1e2   :  { %v812_v53 = vadd.f32 %v4819_v48, %v771_v51  ;;  %3772 = vmatprep.mubr.msk.f32.mxu1 %vm836_vm3, %v822_v44  ;;  %v129_v44 = vld [vmem:[%s5423_s10 + $0x50] sm:$0xff]  ;;  %v4925_v38 = vld [vmem:[%s5426_s4 + $0x18] sm:$0xff] }
 0x1e3   :  { %3773 = vmatmul.mubr.msk.f32.gmra.mrb[16].mxu1 %vm836_vm3, %v823_v49  ;;  %v825_v56 = vmax.f32 %v813_v50, 0.0  ;;  %v4892_v49 = vpack.c.bf16 %v130_v45, %v129_v44  ;;  %v4899_v50 = vld [vmem:[%s5425_s9] ss:$0 sm:$0xff]  ;;  %5465 = vst [vmem:[#allocation2_spill] sm:$0xff] %v4925_v38 }
 0x1e4   :  { %v824_v54 = vmax.f32 %v812_v53, 0.0  ;;  %v3738_v55 = vpop.f32.mrb[20].mxu0  ;;  %4213 = vmatpush3.bf16.msra.mxu1 %v4844_v36 }
 0x1e5   :  { %v815_v57 = vadd.f32 %v3738_v55, %v4819_v48  ;;  %v781_v58 = vpop.f32.mrb[21].mxu0  ;;  %4215 = vmatprep.subr.bf16.mxu1 %v4858_v52 }
 0x1e6   :  { %v814_v59 = vadd.f32 %v4819_v48, %v781_v58  ;;  %3775 = vmatprep.mubr.msk.f32.mxu1 %vm836_vm3, %v824_v54  ;;  %v4911_v58 = vld [vmem:[%s5426_s4 + $0x8] sm:$0xff] }
 0x1e7   :  { %3776 = vmatmul.mubr.msk.f32.gmra.mrb[18].mxu1 %vm836_vm3, %v825_v56  ;;  %v827_v63 = vmax.f32 %v815_v57, 0.0  ;;  %v4906_v57 = vld [vmem:[%s5426_s4] sm:$0xff] }
 0x1e8   :  { %v826_v61 = vmax.f32 %v814_v59, 0.0  ;;  %v3741_v62 = vpop.f32.mrb[22].mxu0  ;;  %4217 = vmatpush3.bf16.msra.mxu1 %v4858_v52 }
 0x1e9   :  { %v817_v3 = vadd.f32 %v3741_v62, %v4819_v48  ;;  %v791_v6 = vpop.f32.mrb[23].mxu0  ;;  %4219 = vmatprep.subr.bf16.mxu1 %v4882_v41 }
 0x1ea   :  { %v816_v32 = vadd.f32 %v4819_v48, %v791_v6  ;;  %3778 = vmatprep.mubr.msk.f32.mxu1 %vm836_vm3, %v826_v61 }
 0x1eb   :  { %3779 = vmatmul.mubr.msk.f32.gmra.mrb[20].mxu1 %vm836_vm3, %v827_v63  ;;  %v829_v34 = vmax.f32 %v817_v3, 0.0 }
 0x1ec   :  { %v828_v33 = vmax.f32 %v816_v32, 0.0  ;;  %4221 = vmatpush3.bf16.msra.mxu1 %v4882_v41 }
 0x1ed   :  { %4223 = vmatprep.subr.bf16.mxu1 %v4892_v49 }
 0x1ee   :  { %3781 = vmatprep.mubr.msk.f32.mxu1 %vm836_vm3, %v828_v33 }
 0x1ef   :  { %3782 = vmatmul.mubr.msk.f32.gmra.mrb[22].mxu1 %vm836_vm3, %v829_v34  ;;  %v4920_v34 = vld [vmem:[%s5426_s4 + $0x10] sm:$0xff] }
 0x1f0   :  { %4225 = vmatpush3.bf16.msra.mxu1 %v4892_v49 }
 0x2ae   :  { %v3768_v51 = vpop.f32.mrb[12].mxu1 }
 0x2af   :  { %v945_v53 = vadd.f32 %v3768_v51, %v4899_v50  ;;  %v939_v54 = vpop.f32.mrb[13].mxu1 }
 0x2b0   :  { %v940_v55 = vadd.f32 %v4899_v50, %v939_v54 }
 0x2b1   :  { %v999_v56 = vmax.f32 %v945_v53, 0.0 }
 0x2b2   :  { %v998_v59 = vmax.f32 %v940_v55, 0.0  ;;  %v3771_v61 = vpop.f32.mrb[14].mxu1 }
 0x2b3   :  { %v955_v62 = vadd.f32 %v3771_v61, %v4899_v50  ;;  %v949_v63 = vpop.f32.mrb[15].mxu1  ;;  %v1011_v32 = vmul.f32 %v999_v56, %v4911_v58  ;;  %v4941_v61 = vld [vmem:[%s5426_s4 + $0x28] sm:$0xff] }
 0x2b4   :  { %v1010_v3 = vmul.f32 %v998_v59, %v4906_v57  ;;  %v950_v6 = vadd.f32 %v4899_v50, %v949_v63  ;;  %v4936_v59 = vld [vmem:[%s5426_s4 + $0x20] sm:$0xff]  ;;  %5467 = vst [vmem:[#allocation4_spill] sm:$0xff] %v4941_v61 }
 0x2b5   :  { %v1001_v33 = vmax.f32 %v955_v62, 0.0  ;;  %5466 = vst [vmem:[#allocation3_spill] sm:$0xff] %v4936_v59 }
 0x2b6   :  { %v1000_v39 = vmax.f32 %v950_v6, 0.0  ;;  %v3774_v44 = vpop.f32.mrb[16].mxu1  ;;  %3808 = vmatprep.mubr.msk.f32.mxu1 %vm836_vm3, %v1010_v3 }
 0x2b7   :  { %v965_v45 = vadd.f32 %v3774_v44, %v4899_v50  ;;  %v959_v51 = vpop.f32.mrb[17].mxu1  ;;  %3809 = vmatmul.mubr.msk.f32.vlgmr.msra.gmra.mrb[24].mxu1 %vm836_vm3, %v1011_v32  ;;  %v1013_v55 = vmul.f32 %v1001_v33, %v4925_v38 }
 0x2b8   :  { %v1012_v53 = vmul.f32 %v1000_v39, %v4920_v34  ;;  %v960_v54 = vadd.f32 %v4899_v50, %v959_v51  ;;  %v4957_v51 = vld [vmem:[%s5426_s4 + $0x38] sm:$0xff] }
 0x2b9   :  { %v1003_v56 = vmax.f32 %v965_v45, 0.0  ;;  %v4952_v45 = vld [vmem:[%s5426_s4 + $0x30] sm:$0xff]  ;;  %5469 = vst [vmem:[#allocation6_spill] sm:$0xff] %v4957_v51 }
 0x2ba   :  { %v1002_v62 = vmax.f32 %v960_v54, 0.0  ;;  %v3777_v63 = vpop.f32.mrb[18].mxu1  ;;  %3811 = vmatprep.mubr.msk.f32.mxu1 %vm836_vm3, %v1012_v53  ;;  %5468 = vst [vmem:[#allocation5_spill] sm:$0xff] %v4952_v45 }
 0x2bb   :  { %v975_v3 = vadd.f32 %v3777_v63, %v4899_v50  ;;  %v969_v6 = vpop.f32.mrb[19].mxu1  ;;  %3812 = vmatmul.mubr.msk.f32.gmra.mrb[26].mxu1 %vm836_vm3, %v1013_v55  ;;  %v1015_v39 = vmul.f32 %v1003_v56, %v4941_v61  ;;  %v4968_v61 = vld [vmem:[%s5426_s4 + $0x40] sm:$0xff] }
 0x2bc   :  { %v1014_v32 = vmul.f32 %v1002_v62, %v4936_v59  ;;  %v970_v33 = vadd.f32 %v4899_v50, %v969_v6  ;;  %5470 = vst [vmem:[#allocation7_spill] sm:$0xff] %v4968_v61 }
 0x2bd   :  { %v1005_v44 = vmax.f32 %v975_v3, 0.0 }
 0x2be   :  { %v1004_v53 = vmax.f32 %v970_v33, 0.0  ;;  %v3780_v54 = vpop.f32.mrb[20].mxu1  ;;  %3814 = vmatprep.mubr.msk.f32.mxu1 %vm836_vm3, %v1014_v32  ;;  %v4973_v32 = vld [vmem:[%s5426_s4 + $0x48] sm:$0xff] }
 0x2bf   :  { %v985_v55 = vadd.f32 %v3780_v54, %v4899_v50  ;;  %v979_v62 = vpop.f32.mrb[21].mxu1  ;;  %3815 = vmatmul.mubr.msk.f32.gmra.mrb[28].mxu1 %vm836_vm3, %v1015_v39  ;;  %v1017_v3 = vmul.f32 %v1005_v44, %v4957_v51  ;;  %5471 = vst [vmem:[#allocation8_spill] sm:$0xff] %v4973_v32 }
 0x2c0   :  { %v1016_v56 = vmul.f32 %v1004_v53, %v4952_v45  ;;  %v980_v63 = vadd.f32 %v4899_v50, %v979_v62  ;;  %v4984_v45 = vld [vmem:[%s5426_s4 + $0x50] sm:$0xff] }
 0x2c1   :  { %v1007_v6 = vmax.f32 %v985_v55, 0.0  ;;  %5472 = vst [vmem:[#allocation9_spill] sm:$0xff] %v4984_v45 }
 0x2c2   :  { %v1006_v33 = vmax.f32 %v980_v63, 0.0  ;;  %v3783_v54 = vpop.f32.mrb[22].mxu1  ;;  %3817 = vmatprep.mubr.msk.f32.mxu1 %vm836_vm3, %v1016_v56  ;;  %v4989_v56 = vld [vmem:[%s5426_s4 + $0x58] sm:$0xff] }
 0x2c3   :  { %v995_v39 = vadd.f32 %v3783_v54, %v4899_v50  ;;  %v989_v53 = vpop.f32.mrb[23].mxu1  ;;  %3818 = vmatmul.mubr.msk.f32.gmra.mrb[30].mxu1 %vm836_vm3, %v1017_v3  ;;  %v1019_v62 = vmul.f32 %v1007_v6, %v4973_v32  ;;  %5473 = vst [vmem:[#allocation10_spill] sm:$0xff] %v4989_v56  ;;  %v132_v54 = vld [vmem:[%s5428_s12] sm:$0xff] }
 0x2c4   :  { %v1018_v44 = vmul.f32 %v1006_v33, %v4968_v61  ;;  %v990_v55 = vadd.f32 %v4899_v50, %v989_v53  ;;  %v5000_v33 = vld [vmem:[%s5427_s3] sm:$0xff] }
 0x2c5   :  { %v1009_v51 = vmax.f32 %v995_v39, 0.0  ;;  %3850 = vmatprep.mubr.msk.f32.mxu0 %vm836_vm3, %v5000_v33  ;;  %v134_v39 = vld [vmem:[%s5428_s12 + $0x10] sm:$0xff] }
 0x2c6   :  { %v1008_v63 = vmax.f32 %v990_v55, 0.0  ;;  %3820 = vmatprep.mubr.msk.f32.mxu1 %vm836_vm3, %v1018_v44  ;;  %v135_v44 = vld [vmem:[%s5428_s12 + $0x18] sm:$0xff] }
 0x2c7   :  { %3821 = vmatmul.mubr.msk.f32.gmra.mrb[32].mxu1 %vm836_vm3, %v1019_v62  ;;  %v1021_v6 = vmul.f32 %v1009_v51, %v4989_v56  ;;  %v133_v51 = vld [vmem:[%s5428_s12 + $0x8] sm:$0xff]  ;;  %v5018_v55 = vpack.c.bf16 %v135_v44, %v134_v39 }
 0x2c8   :  { %v1020_v3 = vmul.f32 %v1008_v63, %v4984_v45  ;;  %v5013_v53 = vpack.c.bf16 %v133_v51, %v132_v54 }
 0x2c9   :  { %5474 = vst [vmem:[#allocation11_spill] sm:$0xff] %v5018_v55 }
 0x2ca   :  { %3823 = vmatprep.mubr.msk.f32.mxu1 %vm836_vm3, %v1020_v3  ;;  %4251 = vmatprep.subr.bf16.mxu1 %v5013_v53 }
 0x2cb   :  { %3824 = vmatmul.mubr.msk.f32.gmra.mrb[34].mxu1 %vm836_vm3, %v1021_v6 }
 0x2cc   :  { %4253 = vmatpush3.bf16.msra.mxu1 %v5013_v53 }
 0x2cd   :  { %4255 = vmatprep.subr.bf16.mxu1 %v5018_v55 }
 0x2d0   :  { %4257 = vmatpush3.bf16.msra.mxu1 %v5018_v55 }
 0x38a   :  { %v3810_v62 = vpop.f32.mrb[24].mxu1 }
 0x38b   :  { %v1124_v63 = vpop.f32.mrb[25].mxu1 }
 0x38c   :  { %v4226_v3 = vpack.c.bf16 %v3810_v62, %v1124_v63 }
 0x38e   :  { %v3813_v6 = vpop.f32.mrb[26].mxu1  ;;  %4227 = vmatprep.subr.bf16.mxu0 %v4226_v3 }
 0x38f   :  { %v1134_v54 = vpop.f32.mrb[27].mxu1  ;;  %4229 = vmatpush3.bf16.msra.mxu0 %v4226_v3 }
 0x390   :  { %v4230_v51 = vpack.c.bf16 %v3813_v6, %v1134_v54 }
 0x392   :  { %v3816_v56 = vpop.f32.mrb[28].mxu1  ;;  %4231 = vmatprep.subr.bf16.mxu0 %v4230_v51 }
 0x393   :  { %v1144_v39 = vpop.f32.mrb[29].mxu1  ;;  %4233 = vmatpush3.bf16.msra.mxu0 %v4230_v51 }
 0x394   :  { %v4234_v44 = vpack.c.bf16 %v3816_v56, %v1144_v39  ;;  %v5027_v56 = vld [vmem:[%s5427_s3 + $0x8] sm:$0xff] }
 0x395   :  { %5475 = vst [vmem:[#allocation12_spill] sm:$0xff] %v5027_v56 }
 0x396   :  { %v3819_v45 = vpop.f32.mrb[30].mxu1  ;;  %4235 = vmatprep.subr.bf16.mxu0 %v4234_v44 }
 0x397   :  { %v1154_v32 = vpop.f32.mrb[31].mxu1  ;;  %4237 = vmatpush3.bf16.msra.mxu0 %v4234_v44  ;;  %v139_v44 = vld [vmem:[%s5430_s14 + $0x10] sm:$0xff] }
 0x398   :  { %v4238_v61 = vpack.c.bf16 %v3819_v45, %v1154_v32  ;;  %v5032_v45 = vld [vmem:[%s5427_s3 + $0x10] sm:$0xff]  ;;  %v138_v32 = vld [vmem:[%s5430_s14 + $0x8] sm:$0xff] }
 0x399   :  { %5476 = vst [vmem:[#allocation13_spill] sm:$0xff] %v5032_v45 }
 0x39a   :  { %v3822_v59 = vpop.f32.mrb[32].mxu1  ;;  %4239 = vmatprep.subr.bf16.mxu0 %v4238_v61 }
 0x39b   :  { %v1164_v55 = vpop.f32.mrb[33].mxu1  ;;  %4241 = vmatpush3.bf16.msra.mxu0 %v4238_v61  ;;  %v137_v61 = vld [vmem:[%s5430_s14] sm:$0xff] }
 0x39c   :  { %v4242_v62 = vpack.c.bf16 %v3822_v59, %v1164_v55  ;;  %v5048_v59 = vld [vmem:[%s5429_s11] sm:$0xf]  ;;  %v5058_v55 = vpack.c.bf16 %v138_v32, %v137_v61 }
 0x39d   :  { %3870 = vmatprep.subr.msk.mxu1 %vm507_vm1, %v5048_v59  ;;  %v5100_v32 = vld [vmem:[%s5432_s13] ss:$0 sm:$0xff] }
 0x39e   :  { %v3825_v63 = vpop.f32.mrb[34].mxu1  ;;  %4243 = vmatprep.subr.bf16.mxu0 %v4242_v62  ;;  %5479 = vst [vmem:[#allocation16_spill] sm:$0xff] %v5100_v32 }
 0x39f   :  { %v1174_v38 = vpop.f32.mrb[35].mxu1  ;;  %4245 = vmatpush3.bf16.msra.mxu0 %v4242_v62  ;;  %v140_v62 = vld [vmem:[%s5430_s14 + $0x18] sm:$0xff] }
 0x3a0   :  { %v4246_v3 = vpack.c.bf16 %v3825_v63, %v1174_v38  ;;  %v5041_v38 = vld [vmem:[%s5427_s3 + $0x18] sm:$0xff]  ;;  %v5084_v63 = vpack.c.bf16 %v140_v62, %v139_v44 }
 0x3a1   :  { %5477 = vst [vmem:[#allocation14_spill] sm:$0xff] %v5041_v38 }
 0x3a2   :  { %4247 = vmatprep.subr.bf16.mxu0 %v4246_v3  ;;  %5478 = vst [vmem:[#allocation15_spill] sm:$0xff] %v5084_v63 }
 0x3a3   :  { %4249 = vmatpush3.bf16.msra.mxu0 %v4246_v3  ;;  %v142_v3 = vld [vmem:[%s5431_s16] sm:$0xff] }
 0x3a4   :  { %4259 = vmatprep.subr.bf16.mxu0 %v5058_v55 }
 0x3a6   :  { %3851 = vmatmul.mubr.msk.f32.vlgmr.msra.gmra.mrb[24].mxu0 %vm836_vm3, %v5027_v56 }
 0x3a7   :  { %3853 = vmatprep.mubr.msk.f32.mxu0 %vm836_vm3, %v5032_v45  ;;  %4261 = vmatpush3.bf16.msra.mxu0 %v5058_v55 }
 0x3a8   :  { %4263 = vmatprep.subr.bf16.mxu0 %v5084_v63 }
 0x3aa   :  { %3854 = vmatmul.mubr.msk.f32.gmra.mrb[26].mxu0 %vm836_vm3, %v5041_v38 }
 0x3ab   :  { %4265 = vmatpush3.bf16.msra.mxu0 %v5084_v63 }
 0x479   :  { %v3852_v6 = vpop.f32.mrb[24].mxu0 }
 0x47a   :  { %v1261_v54 = vpop.f32.mrb[25].mxu0 }
 0x47b   :  { %3864 = vmatprep.mubr.msk.f32.mxu1 %vm147_vm0, %v1261_v54 }
 0x47c   :  { %3865 = vmatmul.mubr.msk.f32.vlgmr.msra.gmra.mrb[36].mxu1 %vm147_vm0, %v3852_v6 }
 0x47d   :  { %v3855_v51 = vpop.f32.mrb[26].mxu0  ;;  %3871 = vmatpush3.msk.msra.mxu1 %vm507_vm1, %v5048_v59 }
 0x47e   :  { %v1271_v39 = vpop.f32.mrb[27].mxu0 }
 0x47f   :  { %3867 = vmatprep.mubr.msk.f32.mxu1 %vm147_vm0, %v1271_v39 }
 0x480   :  { %3868 = vmatmul.mubr.msk.f32.gmra.mrb[38].mxu1 %vm147_vm0, %v3855_v51 }
 0x481   :  { %3872 = vmatprep.mubr.msk.f32.mxu1 %vm470_vm2, %v4516_v0 }
 0x484   :  { %3873 = vmatmul.mubr.msk.f32.vlgmr.msra.gmra.mrb[36].mxu1 %vm470_vm2, %v4521_v1 }
 0x485   :  { %3875 = vmatprep.mubr.msk.f32.mxu1 %vm470_vm2, %v4526_v2 }
 0x488   :  { %3876 = vmatmul.mubr.msk.f32.gmra.mrb[38].mxu1 %vm470_vm2, %v4533_v4 }
 0x489   :  { %3914 = vmatprep.mubr.msk.f32.mxu1 %vm147_vm0, %v4538_v5  ;;  %v143_v5 = vld [vmem:[%s5431_s16 + $0x8] sm:$0xff] }
 0x48a   :  { %v5094_v61 = vpack.c.bf16 %v143_v5, %v142_v3 }
 0x48c   :  { %4267 = vmatprep.subr.bf16.mxu0 %v5094_v61 }
 0x557   :  { %v3874_v6 = vpop.f32.mrb[36].mxu1 }
 0x558   :  { %v1484_v54 = vadd.f32 %v3874_v6, %v5100_v32  ;;  %v1458_v51 = vpop.f32.mrb[37].mxu1  ;;  %v144_v6 = vld [vmem:[%s5431_s16 + $0x10] sm:$0xff] }
 0x559   :  { %v1483_v39 = vadd.f32 %v5100_v32, %v1458_v51 }
 0x55a   :  { %v1488_v38 = vmax.f32 %v1484_v54, 0.0  ;;  %v145_v54 = vld [vmem:[%s5431_s16 + $0x18] sm:$0xff] }
 0x55b   :  { %v1487_v44 = vmax.f32 %v1483_v39, 0.0  ;;  %v3877_v62 = vpop.f32.mrb[38].mxu1  ;;  %v5117_v51 = vpack.c.bf16 %v145_v54, %v144_v6 }
 0x55c   :  { %v1486_v63 = vadd.f32 %v3877_v62, %v5100_v32  ;;  %v1468_v3 = vpop.f32.mrb[39].mxu1 }
 0x55d   :  { %v1485_v5 = vadd.f32 %v5100_v32, %v1468_v3  ;;  %3886 = vmatprep.mubr.msk.f32.mxu0 %vm147_vm0, %v1487_v44  ;;  %5480 = vst [vmem:[#allocation17_spill] sm:$0xff] %v5117_v51 }
 0x55e   :  { %3887 = vmatmul.mubr.msk.f32.vlgmr.msra.gmra.mrb[28].mxu0 %vm147_vm0, %v1488_v38  ;;  %v1490_v56 = vmax.f32 %v1486_v63, 0.0 }
 0x55f   :  { %v1489_v45 = vmax.f32 %v1485_v5, 0.0  ;;  %4269 = vmatpush3.bf16.msra.mxu0 %v5094_v61 }
 0x560   :  { %4271 = vmatprep.subr.bf16.mxu0 %v5117_v51 }
 0x561   :  { %3889 = vmatprep.mubr.msk.f32.mxu0 %vm147_vm0, %v1489_v45  ;;  %v5124_v45 = vld [vmem:[%s5433_s15] ss:$0 sm:$0xff] }
 0x562   :  { %3890 = vmatmul.mubr.msk.f32.gmra.mrb[30].mxu0 %vm147_vm0, %v1490_v56 }
 0x563   :  { %4273 = vmatpush3.bf16.msra.mxu0 %v5117_v51 }
 0x631   :  { %v3888_v56 = vpop.f32.mrb[28].mxu0 }
 0x632   :  { %v1581_v38 = vadd.f32 %v3888_v56, %v5124_v45  ;;  %v1575_v63 = vpop.f32.mrb[29].mxu0  ;;  %v5139_v56 = vld [vmem:[%s5434_s17] ss:$0 sm:$0xff] }
 0x633   :  { %v1576_v39 = vadd.f32 %v5124_v45, %v1575_v63 }
 0x634   :  { %v1595_v3 = vmax.f32 %v1581_v38, 0.0 }
 0x635   :  { %v1594_v44 = vmax.f32 %v1576_v39, 0.0  ;;  %v3891_v62 = vpop.f32.mrb[30].mxu0 }
 0x636   :  { %v1591_v5 = vadd.f32 %v3891_v62, %v5124_v45  ;;  %v1585_v6 = vpop.f32.mrb[31].mxu0 }
 0x637   :  { %v1586_v54 = vadd.f32 %v5124_v45, %v1585_v6  ;;  %3900 = vmatprep.mubr.msk.f32.mxu0 %vm147_vm0, %v1594_v44 }
 0x638   :  { %3901 = vmatmul.mubr.msk.f32.vlgmr.msra.gmra.mrb[32].mxu0 %vm147_vm0, %v1595_v3  ;;  %v1597_v32 = vmax.f32 %v1591_v5, 0.0 }
 0x639   :  { %v1596_v51 = vmax.f32 %v1586_v54, 0.0 }
 0x63b   :  { %3903 = vmatprep.mubr.msk.f32.mxu0 %vm147_vm0, %v1596_v51 }
 0x63c   :  { %3904 = vmatmul.mubr.msk.f32.gmra.mrb[34].mxu0 %vm147_vm0, %v1597_v32 }
 0x63d   :  { %3940 = vmatprep.mubr.msk.f32.mxu0 %vm147_vm0, %v4547_v7 }
 0x70b   :  { %v3902_v38 = vpop.f32.mrb[32].mxu0 }
 0x70c   :  { %v1688_v63 = vadd.f32 %v3902_v38, %v5139_v56  ;;  %v1682_v39 = vpop.f32.mrb[33].mxu0 }
 0x70d   :  { %v1683_v44 = vadd.f32 %v5139_v56, %v1682_v39 }
 0x70e   :  { %v5144_v62 = vadd.f32 %v1688_v63, %v4521_v1 }
 0x70f   :  { %v5147_v51 = vadd.f32 %v1683_v44, %v4516_v0  ;;  %v3905_v32 = vpop.f32.mrb[34].mxu0 }
 0x710   :  { %1706 = vst.msk [vmem:[%s5435_s18 + $0x8] sm:$0xff] %vm470_vm2, %v5144_v62  ;;  %v1698_v7 = vadd.f32 %v3905_v32, %v5139_v56  ;;  %v1692_v3 = vpop.f32.mrb[35].mxu0 }
 0x711   :  { %1705 = vst.msk [vmem:[%s5435_s18] sm:$0xff] %vm470_vm2, %v5147_v51  ;;  %v1693_v1 = vadd.f32 %v5139_v56, %v1692_v3  ;;  %v4274_v0 = vpack.c.bf16 %v5144_v62, %v5147_v51 }
 0x712   :  { %v5164_v5 = vadd.f32 %v1698_v7, %v4533_v4 }
 0x713   :  { %v5167_v6 = vadd.f32 %v1693_v1, %v4526_v2  ;;  %4275 = vmatprep.subr.bf16.mxu1 %v4274_v0  ;;  %4283 = vmatprep.subr.bf16.mxu0 %v4274_v0 }
 0x714   :  { %1708 = vst.msk [vmem:[%s5435_s18 + $0x18] sm:$0xff] %vm470_vm2, %v5164_v5  ;;  %4277 = vmatpush3.bf16.msra.mxu1 %v4274_v0  ;;  %4285 = vmatpush3.bf16.msra.mxu0 %v4274_v0 }
 0x715   :  { %1707 = vst.msk [vmem:[%s5435_s18 + $0x10] sm:$0xff] %vm470_vm2, %v5167_v6  ;;  %v4278_v2 = vpack.c.bf16 %v5164_v5, %v5167_v6 }
 0x717   :  { %4279 = vmatprep.subr.bf16.mxu1 %v4278_v2  ;;  %4287 = vmatprep.subr.bf16.mxu0 %v4278_v2 }
 0x718   :  { %4281 = vmatpush3.bf16.msra.mxu1 %v4278_v2  ;;  %4289 = vmatpush3.bf16.msra.mxu0 %v4278_v2 }
 0x719   :  { %3958 = vmatprep.subr.msk.mxu1 %vm507_vm1, %v4574_v12  ;;  %4291 = vmatprep.subr.bf16.mxu0 %v4730_v35 }
 0x71b   :  { %3915 = vmatmul.mubr.msk.f32.vlgmr.msra.gmra.mrb[40].mxu1 %vm147_vm0, %v4554_v8  ;;  %3941 = vmatmul.mubr.msk.f32.vlgmr.msra.gmra.mrb[36].mxu0 %vm147_vm0, %v4559_v9 }
 0x71c   :  { %3917 = vmatprep.mubr.msk.f32.mxu1 %vm147_vm0, %v4564_v10  ;;  %3943 = vmatprep.mubr.msk.f32.mxu0 %vm147_vm0, %v4569_v11 }
 0x71d   :  { %3959 = vmatpush3.msk.msra.mxu1 %vm507_vm1, %v4574_v12  ;;  %4293 = vmatpush3.bf16.msra.mxu0 %v4730_v35 }
 0x71e   :  { %3978 = vmatprep.subr.msk.mxu1 %vm507_vm1, %v4717_v31  ;;  %4295 = vmatprep.subr.bf16.mxu0 %v4735_v37 }
 0x71f   :  { %3918 = vmatmul.mubr.msk.f32.gmra.mrb[42].mxu1 %vm147_vm0, %v4587_v13  ;;  %3944 = vmatmul.mubr.msk.f32.gmra.mrb[38].mxu0 %vm147_vm0, %v4594_v14 }
 0x720   :  { %3920 = vmatprep.mubr.msk.f32.mxu1 %vm147_vm0, %v4599_v15  ;;  %3946 = vmatprep.mubr.msk.f32.mxu0 %vm147_vm0, %v4604_v16 }
 0x721   :  { %4297 = vmatpush3.bf16.msra.mxu0 %v4735_v37 }
 0x722   :  { %4299 = vmatprep.subr.bf16.mxu0 %v4746_v40 }
 0x723   :  { %3921 = vmatmul.mubr.msk.f32.gmra.mrb[44].mxu1 %vm147_vm0, %v4617_v17  ;;  %3947 = vmatmul.mubr.msk.f32.gmra.mrb[40].mxu0 %vm147_vm0, %v4624_v18 }
 0x724   :  { %3923 = vmatprep.mubr.msk.f32.mxu1 %vm147_vm0, %v4629_v19  ;;  %3949 = vmatprep.mubr.msk.f32.mxu0 %vm147_vm0, %v4634_v20 }
 0x725   :  { %4301 = vmatpush3.bf16.msra.mxu0 %v4746_v40 }
 0x726   :  { %4303 = vmatprep.subr.bf16.mxu0 %v4756_v43 }
 0x727   :  { %3924 = vmatmul.mubr.msk.f32.gmra.mrb[46].mxu1 %vm147_vm0, %v4645_v21  ;;  %3950 = vmatmul.mubr.msk.f32.gmra.mrb[42].mxu0 %vm147_vm0, %v4652_v22 }
 0x728   :  { %3926 = vmatprep.mubr.msk.f32.mxu1 %vm147_vm0, %v4657_v23  ;;  %3952 = vmatprep.mubr.msk.f32.mxu0 %vm147_vm0, %v4662_v24 }
 0x729   :  { %4305 = vmatpush3.bf16.msra.mxu0 %v4756_v43 }
 0x72a   :  { %4307 = vmatprep.subr.bf16.mxu0 %v4766_v46 }
 0x72b   :  { %3927 = vmatmul.mubr.msk.f32.gmra.mrb[48].mxu1 %vm147_vm0, %v4673_v25  ;;  %3953 = vmatmul.mubr.msk.f32.gmra.mrb[44].mxu0 %vm147_vm0, %v4680_v26 }
 0x72c   :  { %3929 = vmatprep.mubr.msk.f32.mxu1 %vm147_vm0, %v4685_v27  ;;  %3955 = vmatprep.mubr.msk.f32.mxu0 %vm147_vm0, %v4690_v28 }
 0x72d   :  { %4309 = vmatpush3.bf16.msra.mxu0 %v4766_v46 }
 0x72e   :  { %4311 = vmatprep.subr.bf16.mxu0 %v4803_v42 }
 0x72f   :  { %3930 = vmatmul.mubr.msk.f32.gmra.mrb[50].mxu1 %vm147_vm0, %v4701_v29  ;;  %3956 = vmatmul.mubr.msk.f32.gmra.mrb[46].mxu0 %vm147_vm0, %v4708_v30 }
 0x731   :  { %4313 = vmatpush3.bf16.msra.mxu0 %v4803_v42 }
 0x732   :  { %4315 = vmatprep.subr.bf16.mxu0 %v4813_v47 }
 0x7ee   :  { %v3916_v4 = vpop.f32.mrb[40].mxu1  ;;  %v3942_v8 = vpop.f32.mrb[36].mxu0 }
 0x7ef   :  { %v1775_v9 = vpop.f32.mrb[41].mxu1  ;;  %v1900_v10 = vpop.f32.mrb[37].mxu0 }
 0x7f0   :  { %3960 = vmatprep.mubr.msk.f32.mxu1 %vm470_vm2, %v1775_v9 }
 0x7f1   :  { %3961 = vmatmul.mubr.msk.f32.vlgmr.msra.gmra.mrb[52].mxu1 %vm470_vm2, %v3916_v4 }
 0x7f2   :  { %v3919_v11 = vpop.f32.mrb[42].mxu1  ;;  %3979 = vmatpush3.msk.msra.mxu1 %vm507_vm1, %v4717_v31  ;;  %v3945_v12 = vpop.f32.mrb[38].mxu0 }
 0x7f3   :  { %v1785_v13 = vpop.f32.mrb[43].mxu1  ;;  %v1910_v14 = vpop.f32.mrb[39].mxu0 }
 0x7f4   :  { %3963 = vmatprep.mubr.msk.f32.mxu1 %vm470_vm2, %v1785_v13 }
 0x7f5   :  { %3964 = vmatmul.mubr.msk.f32.gmra.mrb[54].mxu1 %vm470_vm2, %v3919_v11 }
 0x7f6   :  { %v3922_v15 = vpop.f32.mrb[44].mxu1  ;;  %v3948_v16 = vpop.f32.mrb[40].mxu0 }
 0x7f7   :  { %v1795_v17 = vpop.f32.mrb[45].mxu1  ;;  %v1920_v18 = vpop.f32.mrb[41].mxu0 }
 0x7f8   :  { %3966 = vmatprep.mubr.msk.f32.mxu1 %vm470_vm2, %v1795_v17 }
 0x7f9   :  { %3967 = vmatmul.mubr.msk.f32.gmra.mrb[56].mxu1 %vm470_vm2, %v3922_v15 }
 0x7fa   :  { %v3925_v19 = vpop.f32.mrb[46].mxu1  ;;  %v3951_v20 = vpop.f32.mrb[42].mxu0 }
 0x7fb   :  { %v1805_v21 = vpop.f32.mrb[47].mxu1  ;;  %v1930_v22 = vpop.f32.mrb[43].mxu0 }
 0x7fc   :  { %3969 = vmatprep.mubr.msk.f32.mxu1 %vm470_vm2, %v1805_v21 }
 0x7fd   :  { %3970 = vmatmul.mubr.msk.f32.gmra.mrb[58].mxu1 %vm470_vm2, %v3925_v19 }
 0x7fe   :  { %v3928_v23 = vpop.f32.mrb[48].mxu1  ;;  %v3954_v24 = vpop.f32.mrb[44].mxu0 }
 0x7ff   :  { %v1815_v25 = vpop.f32.mrb[49].mxu1  ;;  %v1940_v26 = vpop.f32.mrb[45].mxu0 }
 0x800   :  { %3972 = vmatprep.mubr.msk.f32.mxu1 %vm470_vm2, %v1815_v25 }
 0x801   :  { %3973 = vmatmul.mubr.msk.f32.gmra.mrb[60].mxu1 %vm470_vm2, %v3928_v23 }
 0x802   :  { %v3931_v27 = vpop.f32.mrb[50].mxu1  ;;  %v3957_v28 = vpop.f32.mrb[46].mxu0 }
 0x803   :  { %v1825_v29 = vpop.f32.mrb[51].mxu1  ;;  %v1950_v30 = vpop.f32.mrb[47].mxu0 }
 0x804   :  { %3975 = vmatprep.mubr.msk.f32.mxu1 %vm470_vm2, %v1825_v29 }
 0x805   :  { %3976 = vmatmul.mubr.msk.f32.gmra.mrb[62].mxu1 %vm470_vm2, %v3931_v27 }
 0x806   :  { %3980 = vmatprep.mubr.msk.f32.mxu1 %vm470_vm2, %v1900_v10 }
 0x809   :  { %3981 = vmatmul.mubr.msk.f32.vlgmr.msra.gmra.mrb[52].mxu1 %vm470_vm2, %v3942_v8 }
 0x80a   :  { %3983 = vmatprep.mubr.msk.f32.mxu1 %vm470_vm2, %v1910_v14 }
 0x80d   :  { %3984 = vmatmul.mubr.msk.f32.gmra.mrb[54].mxu1 %vm470_vm2, %v3945_v12 }
 0x80e   :  { %3986 = vmatprep.mubr.msk.f32.mxu1 %vm470_vm2, %v1920_v18 }
 0x811   :  { %3987 = vmatmul.mubr.msk.f32.gmra.mrb[56].mxu1 %vm470_vm2, %v3948_v16 }
 0x812   :  { %3989 = vmatprep.mubr.msk.f32.mxu1 %vm470_vm2, %v1930_v22 }
 0x815   :  { %3990 = vmatmul.mubr.msk.f32.gmra.mrb[58].mxu1 %vm470_vm2, %v3951_v20 }
 0x816   :  { %3992 = vmatprep.mubr.msk.f32.mxu1 %vm470_vm2, %v1940_v26 }
 0x819   :  { %3993 = vmatmul.mubr.msk.f32.gmra.mrb[60].mxu1 %vm470_vm2, %v3954_v24 }
 0x81a   :  { %3995 = vmatprep.mubr.msk.f32.mxu1 %vm470_vm2, %v1950_v30 }
 0x81d   :  { %3996 = vmatmul.mubr.msk.f32.gmra.mrb[62].mxu1 %vm470_vm2, %v3957_v28 }
 0x81e   :  { %4106 = vmatprep.mubr.msk.f32.mxu1 %vm836_vm3, %v5000_v33 }
 0x8dc   :  { %v3982_v31 = vpop.f32.mrb[52].mxu1 }
 0x8dd   :  { %v2282_v35 = vadd.f32 %v3982_v31, %v4819_v48  ;;  %v2222_v37 = vpop.f32.mrb[53].mxu1 }
 0x8de   :  { %v2281_v40 = vadd.f32 %v4819_v48, %v2222_v37 }
 0x8df   :  { %v2294_v42 = vmax.f32 %v2282_v35, 0.0 }
 0x8e0   :  { %v2293_v43 = vmax.f32 %v2281_v40, 0.0  ;;  %v3985_v46 = vpop.f32.mrb[54].mxu1 }
 0x8e1   :  { %v2284_v54 = vadd.f32 %v3985_v46, %v4819_v48  ;;  %v2232_v38 = vpop.f32.mrb[55].mxu1 }
 0x8e2   :  { %v2283_v63 = vadd.f32 %v4819_v48, %v2232_v38  ;;  %4022 = vmatprep.mubr.msk.f32.mxu0 %vm836_vm3, %v2293_v43 }
 0x8e3   :  { %4023 = vmatmul.mubr.msk.f32.vlgmr.msra.gmra.mrb[48].mxu0 %vm836_vm3, %v2294_v42  ;;  %v2296_v44 = vmax.f32 %v2284_v54, 0.0 }
 0x8e4   :  { %v2295_v39 = vmax.f32 %v2283_v63, 0.0  ;;  %v3988_v33 = vpop.f32.mrb[56].mxu1  ;;  %4317 = vmatpush3.bf16.msra.mxu0 %v4813_v47 }
 0x8e5   :  { %v2286_v32 = vadd.f32 %v3988_v33, %v4819_v48  ;;  %v2242_v7 = vpop.f32.mrb[57].mxu1  ;;  %4319 = vmatprep.subr.bf16.mxu0 %v4830_v60  ;;  %v5483_v33 = vld [vmem:[#allocation3_spill] sm:$0xff] }
 0x8e6   :  { %v2285_v3 = vadd.f32 %v4819_v48, %v2242_v7  ;;  %4025 = vmatprep.mubr.msk.f32.mxu0 %vm836_vm3, %v2295_v39 }
 0x8e7   :  { %4026 = vmatmul.mubr.msk.f32.gmra.mrb[50].mxu0 %vm836_vm3, %v2296_v44  ;;  %v2298_v2 = vmax.f32 %v2286_v32, 0.0 }
 0x8e8   :  { %v2297_v1 = vmax.f32 %v2285_v3, 0.0  ;;  %v3991_v0 = vpop.f32.mrb[58].mxu1  ;;  %4321 = vmatpush3.bf16.msra.mxu0 %v4830_v60 }
 0x8e9   :  { %v2288_v4 = vadd.f32 %v3991_v0, %v4819_v48  ;;  %v2252_v47 = vpop.f32.mrb[59].mxu1  ;;  %4323 = vmatprep.subr.bf16.mxu0 %v4844_v36 }
 0x8ea   :  { %v2287_v8 = vadd.f32 %v4819_v48, %v2252_v47  ;;  %4028 = vmatprep.mubr.msk.f32.mxu0 %vm836_vm3, %v2297_v1 }
 0x8eb   :  { %4029 = vmatmul.mubr.msk.f32.gmra.mrb[52].mxu0 %vm836_vm3, %v2298_v2  ;;  %v2300_v11 = vmax.f32 %v2288_v4, 0.0  ;;  %v5485_v4 = vld [vmem:[#allocation5_spill] sm:$0xff] }
 0x8ec   :  { %v2299_v9 = vmax.f32 %v2287_v8, 0.0  ;;  %v3994_v10 = vpop.f32.mrb[60].mxu1  ;;  %4325 = vmatpush3.bf16.msra.mxu0 %v4844_v36 }
 0x8ed   :  { %v2290_v12 = vadd.f32 %v3994_v10, %v4819_v48  ;;  %v2262_v60 = vpop.f32.mrb[61].mxu1  ;;  %4327 = vmatprep.subr.bf16.mxu0 %v4858_v52 }
 0x8ee   :  { %v2289_v13 = vadd.f32 %v4819_v48, %v2262_v60  ;;  %4031 = vmatprep.mubr.msk.f32.mxu0 %vm836_vm3, %v2299_v9  ;;  %v5486_v9 = vld [vmem:[#allocation6_spill] sm:$0xff] }
 0x8ef   :  { %4032 = vmatmul.mubr.msk.f32.gmra.mrb[54].mxu0 %vm836_vm3, %v2300_v11  ;;  %v2302_v16 = vmax.f32 %v2290_v12, 0.0 }
 0x8f0   :  { %v2301_v14 = vmax.f32 %v2289_v13, 0.0  ;;  %v3997_v15 = vpop.f32.mrb[62].mxu1  ;;  %4329 = vmatpush3.bf16.msra.mxu0 %v4858_v52 }
 0x8f1   :  { %v2292_v17 = vadd.f32 %v3997_v15, %v4819_v48  ;;  %v2272_v36 = vpop.f32.mrb[63].mxu1  ;;  %4331 = vmatprep.subr.bf16.mxu0 %v4882_v41  ;;  %v5487_v15 = vld [vmem:[#allocation7_spill] sm:$0xff] }
 0x8f2   :  { %v2291_v18 = vadd.f32 %v4819_v48, %v2272_v36  ;;  %4034 = vmatprep.mubr.msk.f32.mxu0 %vm836_vm3, %v2301_v14  ;;  %v5488_v36 = vld [vmem:[#allocation8_spill] sm:$0xff] }
 0x8f3   :  { %4035 = vmatmul.mubr.msk.f32.gmra.mrb[56].mxu0 %vm836_vm3, %v2302_v16  ;;  %v2304_v20 = vmax.f32 %v2292_v17, 0.0 }
 0x8f4   :  { %v2303_v19 = vmax.f32 %v2291_v18, 0.0  ;;  %4333 = vmatpush3.bf16.msra.mxu0 %v4882_v41 }
 0x8f5   :  { %4335 = vmatprep.subr.bf16.mxu0 %v4892_v49 }
 0x8f6   :  { %4037 = vmatprep.mubr.msk.f32.mxu0 %vm836_vm3, %v2303_v19 }
 0x8f7   :  { %4038 = vmatmul.mubr.msk.f32.gmra.mrb[58].mxu0 %vm836_vm3, %v2304_v20 }
 0x8f8   :  { %4337 = vmatpush3.bf16.msra.mxu0 %v4892_v49 }
 0x8f9   :  { %4363 = vmatprep.subr.bf16.mxu0 %v5013_v53 }
 0x9b6   :  { %v4024_v52 = vpop.f32.mrb[48].mxu0 }
 0x9b7   :  { %v2413_v48 = vadd.f32 %v4024_v52, %v4899_v50  ;;  %v2407_v21 = vpop.f32.mrb[49].mxu0  ;;  %v5489_v52 = vld [vmem:[#allocation9_spill] sm:$0xff] }
 0x9b8   :  { %v2408_v22 = vadd.f32 %v4899_v50, %v2407_v21  ;;  %v5490_v21 = vld [vmem:[#allocation10_spill] sm:$0xff] }
 0x9b9   :  { %v2467_v23 = vmax.f32 %v2413_v48, 0.0 }
 0x9ba   :  { %v2466_v24 = vmax.f32 %v2408_v22, 0.0  ;;  %v4027_v41 = vpop.f32.mrb[50].mxu0 }
 0x9bb   :  { %v2423_v25 = vadd.f32 %v4027_v41, %v4899_v50  ;;  %v2417_v26 = vpop.f32.mrb[51].mxu0  ;;  %v2479_v49 = vmul.f32 %v2467_v23, %v4911_v58  ;;  %v5482_v58 = vld [vmem:[#allocation11_spill] sm:$0xff] }
 0x9bc   :  { %v2478_v27 = vmul.f32 %v2466_v24, %v4906_v57  ;;  %v2418_v28 = vadd.f32 %v4899_v50, %v2417_v26  ;;  %v5481_v57 = vld [vmem:[#allocation2_spill] sm:$0xff] }
 0x9bd   :  { %v2469_v29 = vmax.f32 %v2423_v25, 0.0 }
 0x9be   :  { %v2468_v30 = vmax.f32 %v2418_v28, 0.0  ;;  %v4030_v31 = vpop.f32.mrb[52].mxu0  ;;  %4064 = vmatprep.mubr.msk.f32.mxu0 %vm836_vm3, %v2478_v27 }
 0x9bf   :  { %v2433_v35 = vadd.f32 %v4030_v31, %v4899_v50  ;;  %v2427_v37 = vpop.f32.mrb[53].mxu0  ;;  %4065 = vmatmul.mubr.msk.f32.vlgmr.msra.gmra.mrb[60].mxu0 %vm836_vm3, %v2479_v49  ;;  %v2481_v46 = vmul.f32 %v2469_v29, %v5481_v57 }
 0x9c0   :  { %v2480_v40 = vmul.f32 %v2468_v30, %v4920_v34  ;;  %v2428_v43 = vadd.f32 %v4899_v50, %v2427_v37  ;;  %4365 = vmatpush3.bf16.msra.mxu0 %v5013_v53  ;;  %v5484_v53 = vld [vmem:[#allocation4_spill] sm:$0xff] }
 0x9c1   :  { %v2471_v42 = vmax.f32 %v2433_v35, 0.0  ;;  %4367 = vmatprep.subr.bf16.mxu0 %v5482_v58 }
 0x9c2   :  { %v2470_v54 = vmax.f32 %v2428_v43, 0.0  ;;  %v4033_v38 = vpop.f32.mrb[54].mxu0  ;;  %4067 = vmatprep.mubr.msk.f32.mxu0 %vm836_vm3, %v2480_v40 }
 0x9c3   :  { %v2443_v63 = vadd.f32 %v4033_v38, %v4899_v50  ;;  %v2437_v39 = vpop.f32.mrb[55].mxu0  ;;  %4068 = vmatmul.mubr.msk.f32.gmra.mrb[62].mxu0 %vm836_vm3, %v2481_v46  ;;  %v2483_v32 = vmul.f32 %v2471_v42, %v5484_v53  ;;  %v5491_v42 = vld [vmem:[#allocation12_spill] sm:$0xff]  ;;  %v5494_v38 = vld [vmem:[#allocation14_spill] sm:$0xff] }
 0x9c4   :  { %v2482_v34 = vmul.f32 %v2470_v54, %v5483_v33  ;;  %v2438_v44 = vadd.f32 %v4899_v50, %v2437_v39  ;;  %4369 = vmatpush3.bf16.msra.mxu0 %v5482_v58  ;;  %v5492_v58 = vld [vmem:[#allocation13_spill] sm:$0xff]  ;;  %v5493_v54 = vld [vmem:[#allocation15_spill] sm:$0xff] }
 0x9c5   :  { %v2473_v7 = vmax.f32 %v2443_v63, 0.0  ;;  %4126 = vmatprep.subr.msk.mxu0 %vm507_vm1, %v5048_v59 }
 0x9c6   :  { %v2472_v3 = vmax.f32 %v2438_v44, 0.0  ;;  %v4036_v1 = vpop.f32.mrb[56].mxu0  ;;  %4070 = vmatprep.mubr.msk.f32.mxu0 %vm836_vm3, %v2482_v34  ;;  %v5495_v44 = vld [vmem:[#allocation16_spill] sm:$0xff] }
 0x9c7   :  { %v2453_v0 = vadd.f32 %v4036_v1, %v4899_v50  ;;  %v2447_v2 = vpop.f32.mrb[57].mxu0  ;;  %4071 = vmatmul.mubr.msk.f32.gmra.mrb[64].mxu0 %vm836_vm3, %v2483_v32  ;;  %v2485_v10 = vmul.f32 %v2473_v7, %v5486_v9  ;;  %v5496_v9 = vld [vmem:[#allocation17_spill] sm:$0xff] }
 0x9c8   :  { %v2484_v47 = vmul.f32 %v2472_v3, %v5485_v4  ;;  %v2448_v8 = vadd.f32 %v4899_v50, %v2447_v2 }
 0x9c9   :  { %v2475_v11 = vmax.f32 %v2453_v0, 0.0 }
 0x9ca   :  { %v2474_v12 = vmax.f32 %v2448_v8, 0.0  ;;  %v4039_v60 = vpop.f32.mrb[58].mxu0  ;;  %4073 = vmatprep.mubr.msk.f32.mxu0 %vm836_vm3, %v2484_v47 }
 0x9cb   :  { %v2463_v13 = vadd.f32 %v4039_v60, %v4899_v50  ;;  %v2457_v14 = vpop.f32.mrb[59].mxu0  ;;  %4074 = vmatmul.mubr.msk.f32.gmra.mrb[66].mxu0 %vm836_vm3, %v2485_v10  ;;  %v2487_v18 = vmul.f32 %v2475_v11, %v5488_v36 }
 0x9cc   :  { %v2486_v16 = vmul.f32 %v2474_v12, %v5487_v15  ;;  %v2458_v17 = vadd.f32 %v4899_v50, %v2457_v14 }
 0x9cd   :  { %v2477_v19 = vmax.f32 %v2463_v13, 0.0 }
 0x9ce   :  { %v2476_v20 = vmax.f32 %v2458_v17, 0.0  ;;  %4076 = vmatprep.mubr.msk.f32.mxu0 %vm836_vm3, %v2486_v16 }
 0x9cf   :  { %4077 = vmatmul.mubr.msk.f32.gmra.mrb[68].mxu0 %vm836_vm3, %v2487_v18  ;;  %v2489_v22 = vmul.f32 %v2477_v19, %v5490_v21 }
 0x9d0   :  { %v2488_v48 = vmul.f32 %v2476_v20, %v5489_v52 }
 0x9d2   :  { %4079 = vmatprep.mubr.msk.f32.mxu0 %vm836_vm3, %v2488_v48 }
 0x9d3   :  { %4080 = vmatmul.mubr.msk.f32.gmra.mrb[70].mxu0 %vm836_vm3, %v2489_v22 }
 0xa92   :  { %v4066_v23 = vpop.f32.mrb[60].mxu0 }
 0xa93   :  { %v2592_v24 = vpop.f32.mrb[61].mxu0 }
 0xa94   :  { %v4338_v41 = vpack.c.bf16 %v4066_v23, %v2592_v24 }
 0xa96   :  { %v4069_v50 = vpop.f32.mrb[62].mxu0  ;;  %4339 = vmatprep.subr.bf16.mxu1 %v4338_v41 }
 0xa97   :  { %v2602_v25 = vpop.f32.mrb[63].mxu0  ;;  %4341 = vmatpush3.bf16.msra.mxu1 %v4338_v41 }
 0xa98   :  { %v4342_v26 = vpack.c.bf16 %v4069_v50, %v2602_v25 }
 0xa9a   :  { %v4072_v27 = vpop.f32.mrb[64].mxu0  ;;  %4343 = vmatprep.subr.bf16.mxu1 %v4342_v26 }
 0xa9b   :  { %v2612_v28 = vpop.f32.mrb[65].mxu0  ;;  %4345 = vmatpush3.bf16.msra.mxu1 %v4342_v26 }
 0xa9c   :  { %v4346_v49 = vpack.c.bf16 %v4072_v27, %v2612_v28 }
 0xa9e   :  { %v4075_v29 = vpop.f32.mrb[66].mxu0  ;;  %4347 = vmatprep.subr.bf16.mxu1 %v4346_v49 }
 0xa9f   :  { %v2622_v30 = vpop.f32.mrb[67].mxu0  ;;  %4349 = vmatpush3.bf16.msra.mxu1 %v4346_v49 }
 0xaa0   :  { %v4350_v31 = vpack.c.bf16 %v4075_v29, %v2622_v30 }
 0xaa2   :  { %v4078_v35 = vpop.f32.mrb[68].mxu0  ;;  %4351 = vmatprep.subr.bf16.mxu1 %v4350_v31 }
 0xaa3   :  { %v2632_v37 = vpop.f32.mrb[69].mxu0  ;;  %4353 = vmatpush3.bf16.msra.mxu1 %v4350_v31 }
 0xaa4   :  { %v4354_v40 = vpack.c.bf16 %v4078_v35, %v2632_v37 }
 0xaa6   :  { %v4081_v43 = vpop.f32.mrb[70].mxu0  ;;  %4355 = vmatprep.subr.bf16.mxu1 %v4354_v40 }
 0xaa7   :  { %v2642_v57 = vpop.f32.mrb[71].mxu0  ;;  %4357 = vmatpush3.bf16.msra.mxu1 %v4354_v40 }
 0xaa8   :  { %v4358_v46 = vpack.c.bf16 %v4081_v43, %v2642_v57 }
 0xaaa   :  { %4359 = vmatprep.subr.bf16.mxu1 %v4358_v46 }
 0xaab   :  { %4361 = vmatpush3.bf16.msra.mxu1 %v4358_v46 }
 0xaac   :  { %4371 = vmatprep.subr.bf16.mxu1 %v5058_v55 }
 0xaae   :  { %4107 = vmatmul.mubr.msk.f32.vlgmr.msra.gmra.mrb[64].mxu1 %vm836_vm3, %v5491_v42 }
 0xaaf   :  { %4109 = vmatprep.mubr.msk.f32.mxu1 %vm836_vm3, %v5492_v58  ;;  %4373 = vmatpush3.bf16.msra.mxu1 %v5058_v55 }
 0xab0   :  { %4375 = vmatprep.subr.bf16.mxu1 %v5493_v54 }
 0xab2   :  { %4110 = vmatmul.mubr.msk.f32.gmra.mrb[66].mxu1 %vm836_vm3, %v5494_v38 }
 0xab3   :  { %4377 = vmatpush3.bf16.msra.mxu1 %v5493_v54 }
 0xab4   :  { %4379 = vmatprep.subr.bf16.mxu1 %v5094_v61 }
 0xb81   :  { %v4108_v63 = vpop.f32.mrb[64].mxu1 }
 0xb82   :  { %v2717_v39 = vpop.f32.mrb[65].mxu1 }
 0xb83   :  { %4120 = vmatprep.mubr.msk.f32.mxu0 %vm147_vm0, %v2717_v39 }
 0xb84   :  { %4121 = vmatmul.mubr.msk.f32.vlgmr.msra.gmra.mrb[72].mxu0 %vm147_vm0, %v4108_v63 }
 0xb85   :  { %v4111_v33 = vpop.f32.mrb[66].mxu1  ;;  %4127 = vmatpush3.msk.msra.mxu0 %vm507_vm1, %v5048_v59 }
 0xb86   :  { %v2727_v55 = vpop.f32.mrb[67].mxu1 }
 0xb87   :  { %4123 = vmatprep.mubr.msk.f32.mxu0 %vm147_vm0, %v2727_v55 }
 0xb88   :  { %4124 = vmatmul.mubr.msk.f32.gmra.mrb[74].mxu0 %vm147_vm0, %v4111_v33 }
 0xb89   :  { %4128 = vmatprep.mubr.msk.f32.mxu0 %vm470_vm2, %v5147_v51 }
 0xb8c   :  { %4129 = vmatmul.mubr.msk.f32.vlgmr.msra.gmra.mrb[72].mxu0 %vm470_vm2, %v5144_v62 }
 0xb8d   :  { %4131 = vmatprep.mubr.msk.f32.mxu0 %vm470_vm2, %v5167_v6 }
 0xb90   :  { %4132 = vmatmul.mubr.msk.f32.gmra.mrb[74].mxu0 %vm470_vm2, %v5164_v5 }
 0xc5f   :  { %v4130_v34 = vpop.f32.mrb[72].mxu0 }
 0xc60   :  { %v2931_v59 = vadd.f32 %v4130_v34, %v5495_v44  ;;  %v2911_v53 = vpop.f32.mrb[73].mxu0 }
 0xc61   :  { %v2930_v32 = vadd.f32 %v5495_v44, %v2911_v53 }
 0xc62   :  { %v2935_v1 = vmax.f32 %v2931_v59, 0.0 }
 0xc63   :  { %v2934_v7 = vmax.f32 %v2930_v32, 0.0  ;;  %v4133_v3 = vpop.f32.mrb[74].mxu0 }
 0xc64   :  { %v2933_v0 = vadd.f32 %v4133_v3, %v5495_v44  ;;  %v2921_v2 = vpop.f32.mrb[75].mxu0 }
 0xc65   :  { %v2932_v4 = vadd.f32 %v5495_v44, %v2921_v2  ;;  %4142 = vmatprep.mubr.msk.f32.mxu1 %vm147_vm0, %v2934_v7 }
 0xc66   :  { %4143 = vmatmul.mubr.msk.f32.vlgmr.msra.gmra.mrb[68].mxu1 %vm147_vm0, %v2935_v1  ;;  %v2937_v8 = vmax.f32 %v2933_v0, 0.0 }
 0xc67   :  { %v2936_v47 = vmax.f32 %v2932_v4, 0.0  ;;  %4381 = vmatpush3.bf16.msra.mxu1 %v5094_v61 }
 0xc68   :  { %4383 = vmatprep.subr.bf16.mxu1 %v5496_v9 }
 0xc69   :  { %4145 = vmatprep.mubr.msk.f32.mxu1 %vm147_vm0, %v2936_v47 }
 0xc6a   :  { %4146 = vmatmul.mubr.msk.f32.gmra.mrb[70].mxu1 %vm147_vm0, %v2937_v8 }
 0xc6b   :  { %4385 = vmatpush3.bf16.msra.mxu1 %v5496_v9 }
 0xd39   :  { %v4144_v10 = vpop.f32.mrb[68].mxu1 }
 0xd3a   :  { %v3022_v11 = vadd.f32 %v4144_v10, %v5124_v45  ;;  %v3016_v12 = vpop.f32.mrb[69].mxu1 }
 0xd3b   :  { %v3017_v60 = vadd.f32 %v5124_v45, %v3016_v12 }
 0xd3c   :  { %v3036_v15 = vmax.f32 %v3022_v11, 0.0 }
 0xd3d   :  { %v3035_v13 = vmax.f32 %v3017_v60, 0.0  ;;  %v4147_v14 = vpop.f32.mrb[70].mxu1 }
 0xd3e   :  { %v3032_v61 = vadd.f32 %v4147_v14, %v5124_v45  ;;  %v3026_v16 = vpop.f32.mrb[71].mxu1 }
 0xd3f   :  { %v3027_v17 = vadd.f32 %v5124_v45, %v3026_v16  ;;  %4156 = vmatprep.mubr.msk.f32.mxu1 %vm147_vm0, %v3035_v13 }
 0xd40   :  { %4157 = vmatmul.mubr.msk.f32.vlgmr.msra.gmra.mrb[72].mxu1 %vm147_vm0, %v3036_v15  ;;  %v3038_v18 = vmax.f32 %v3032_v61, 0.0 }
 0xd41   :  { %v3037_v36 = vmax.f32 %v3027_v17, 0.0 }
 0xd43   :  { %4159 = vmatprep.mubr.msk.f32.mxu1 %vm147_vm0, %v3037_v36 }
 0xd44   :  { %4160 = vmatmul.mubr.msk.f32.gmra.mrb[74].mxu1 %vm147_vm0, %v3038_v18 }
 0xe13   :  { %v4158_v19 = vpop.f32.mrb[72].mxu1 }
 0xe14   :  { %v3123_v20 = vadd.f32 %v4158_v19, %v5139_v56  ;;  %v3117_v52 = vpop.f32.mrb[73].mxu1 }
 0xe15   :  { %v3118_v48 = vadd.f32 %v5139_v56, %v3117_v52 }
 0xe16   :  { %v3137_v21 = vadd.f32 %v3123_v20, %v5144_v62 }
 0xe17   :  { %v3136_v45 = vadd.f32 %v3118_v48, %v5147_v51  ;;  %v4161_v22 = vpop.f32.mrb[74].mxu1 }
 0xe18   :  { %3345 = vst.msk [vmem:[%s5435_s18 + $0x28] sm:$0xff] %vm470_vm2, %v3137_v21  ;;  %v3133_v23 = vadd.f32 %v4161_v22, %v5139_v56  ;;  %v3127_v24 = vpop.f32.mrb[75].mxu1 }
 0xe19   :  { %3344 = vst.msk [vmem:[%s5435_s18 + $0x20] sm:$0xff] %vm470_vm2, %v3136_v45  ;;  %v3128_v41 = vadd.f32 %v5139_v56, %v3127_v24 }
 0xe1a   :  { %v3139_v62 = vadd.f32 %v3133_v23, %v5164_v5 }
 0xe1b   :  { %v3138_v51 = vadd.f32 %v3128_v41, %v5167_v6 }
 0xe1c   :  { %3347 = vst.msk [vmem:[%s5435_s18 + $0x38] sm:$0xff] %vm470_vm2, %v3139_v62 }
 0xe1d   :  { %3346 = vst.msk [vmem:[%s5435_s18 + $0x30] sm:$0xff] %vm470_vm2, %v3138_v51 }

</bundles_post_ra>
